<compile_context>
chip_gen: v7x
topology: tpu7x:2x2x1
jax: 0.10.0
libtpu: 0.0.40
codegen_flags: <defaults>
</compile_context>

<pallas_src>
import functools
import math

import jax
import jax.numpy as jnp
from jax.experimental import pallas as pl
from jax.experimental.pallas import tpu as pltpu

ACT_DTYPE = jnp.bfloat16      # working activation dtype between matmuls
MM_DTYPE = jnp.bfloat16       # MXU operand dtype for encoder weights
LN_EPS = 1e-12


# ---------------------------- in-kernel helpers (f32) ----------------------------

def _layer_norm_f32(x, gamma, beta, eps):
    mean = jnp.mean(x, axis=-1, keepdims=True)
    var = jnp.mean(jnp.square(x - mean), axis=-1, keepdims=True)
    return (x - mean) * jax.lax.rsqrt(var + eps) * gamma + beta


def _gelu_f32(x):
    # exact (erf) GELU, as in BERT
    return 0.5 * x * (1.0 + jax.lax.erf(x * (1.0 / math.sqrt(2.0))))


# ---------------------------- fused whole-model kernel ----------------------------

def _fused_bert_kernel(word_ref, pos_type_ref, mask_ref, emb_g_ref, emb_b_ref,
                       wqkv_ref, bqkv_ref, wo_ref, wi_ref, bi_ref, wo2_ref, vecs_ref,
                       pool_w_ref, pool_b_ref, fc_w_ref, fc_b_ref,
                       logits_ref, *, num_layers, num_heads, head_dim, eps):
    S, H = word_ref.shape                                  # (S, H) per batch element

    # ---- embeddings (sum done here, gather stays in XLA) + embedding LayerNorm ----
    emb = word_ref[...].astype(jnp.float32) + pos_type_ref[...].astype(jnp.float32)
    x32 = _layer_norm_f32(emb, emb_g_ref[...], emb_b_ref[...], eps)   # (S, H) f32
    x = x32.astype(ACT_DTYPE)
    bias = mask_ref[...]                                   # (1, S) f32 additive key mask

    # ---- encoder layers (static unroll; all weights VMEM-resident) ----
    for l in range(num_layers):
        vec = vecs_ref[l]                                  # (6, H) f32 bundled vectors
        bo, ln1_g, ln1_b = vec[0:1, :], vec[1:2, :], vec[2:3, :]
        bo2, ln2_g, ln2_b = vec[3:4, :], vec[4:5, :], vec[5:6, :]

        # fused QKV projection (softmax scale already folded into the Q columns)
        qkv = (jnp.dot(x, wqkv_ref[l], preferred_element_type=jnp.float32)
               + bqkv_ref[l])                              # (S, 3H) f32
        qkv = qkv.astype(MM_DTYPE)
        wo = wo_ref[l]                                     # (H, H) bf16

        # attention: per-head softmax, context accumulated straight into the W_o projection
        proj = jnp.zeros((S, H), jnp.float32)
        for h in range(num_heads):
            lo = h * head_dim
            q = qkv[:, lo:lo + head_dim]
            k = qkv[:, H + lo:H + lo + head_dim]
            v = qkv[:, 2 * H + lo:2 * H + lo + head_dim]
            # q @ k.T without an explicit transpose: contract last dims on the MXU.
            s = jax.lax.dot_general(q, k, (((1,), (1,)), ((), ())),
                                    preferred_element_type=jnp.float32) + bias
            s = s - jnp.max(s, axis=-1, keepdims=True)
            p = jnp.exp(s)
            p = p / jnp.sum(p, axis=-1, keepdims=True)     # exact divide (parity)
            ctx = jnp.dot(p.astype(MM_DTYPE), v, preferred_element_type=jnp.float32)
            proj = proj + jnp.dot(ctx.astype(MM_DTYPE), wo[lo:lo + head_dim, :],
                                  preferred_element_type=jnp.float32)

        y = proj + bo + x.astype(jnp.float32)              # output bias + residual
        x1 = _layer_norm_f32(y, ln1_g, ln1_b, eps)         # (S, H) f32
        x1_bf = x1.astype(ACT_DTYPE)

        # FFN: Wi -> GELU -> Wo2 + residual + LayerNorm2
        h1 = jnp.dot(x1_bf, wi_ref[l], preferred_element_type=jnp.float32) + bi_ref[l]
        h1 = _gelu_f32(h1)
        h2 = (jnp.dot(h1.astype(MM_DTYPE), wo2_ref[l],
                      preferred_element_type=jnp.float32) + bo2)
        x32 = _layer_norm_f32(h2 + x1, ln2_g, ln2_b, eps)
        x = x32.astype(ACT_DTYPE)

    # ---- pooler ([CLS] -> Linear -> tanh) + classifier, kept in f32 for parity ----
    # TODO(synk): nn.Dropout(0.1) is identity at inference; stochastic drop not applied.
    cls = x32[0:1, :]                                      # (1, H) f32
    pooled = jnp.tanh(jnp.dot(cls, pool_w_ref[...],
                              preferred_element_type=jnp.float32) + pool_b_ref[...])
    logits = jnp.dot(pooled, fc_w_ref[...],
                     preferred_element_type=jnp.float32) + fc_b_ref[...]
    logits_ref[...] = logits                               # (1, 128) lane-dense store


# ---------------------------- model definition ----------------------------

CFG = dict(vocab_size=128, hidden=32, num_layers=2, num_heads=2,
           intermediate=64, max_pos=16, type_vocab=2, num_classes=3)


def init_params(key, cfg):
    """Raw f32 parameters mirroring the PyTorch module structure."""
    H, I = cfg["hidden"], cfg["intermediate"]
    keys = iter(jax.random.split(key, 64))

    def w(shape, scale=0.02):
        return (scale * jax.random.normal(next(keys), shape)).astype(jnp.float32)

    params = {
        "word_emb": w((cfg["vocab_size"], H)),
        "pos_emb": w((cfg["max_pos"], H)),
        "type_emb": w((cfg["type_vocab"], H)),
        "emb_ln_g": jnp.ones((H,), jnp.float32),
        "emb_ln_b": jnp.zeros((H,), jnp.float32),
        "layers": [],
        "pool_w": w((H, H)),
        "pool_b": jnp.zeros((H,), jnp.float32),
        "fc_w": w((H, cfg["num_classes"])),
        "fc_b": jnp.zeros((cfg["num_classes"],), jnp.float32),
    }
    for _ in range(cfg["num_layers"]):
        params["layers"].append({
            "wq": w((H, H)), "bq": jnp.zeros((H,), jnp.float32),
            "wk": w((H, H)), "bk": jnp.zeros((H,), jnp.float32),
            "wv": w((H, H)), "bv": jnp.zeros((H,), jnp.float32),
            "wo": w((H, H)), "bo": jnp.zeros((H,), jnp.float32),
            "ln1_g": jnp.ones((H,), jnp.float32), "ln1_b": jnp.zeros((H,), jnp.float32),
            "wi": w((H, I)), "bi": jnp.zeros((I,), jnp.float32),
            "wo2": w((I, H)), "bo2": jnp.zeros((H,), jnp.float32),
            "ln2_g": jnp.ones((H,), jnp.float32), "ln2_b": jnp.zeros((H,), jnp.float32),
        })
    return params


def prepare_params(params, cfg):
    """One-time repack: fold softmax scale into Q weights, fuse Wq|Wk|Wv, stack all layer
    weights with a leading layer axis, bundle per-layer (1,H) vectors into one (L,6,H) slab,
    fold pos+type-0 embeddings into one table, pad the classifier output to 128 lanes."""
    H, I, C = cfg["hidden"], cfg["intermediate"], cfg["num_classes"]
    head_dim = H // cfg["num_heads"]
    scale = 1.0 / math.sqrt(head_dim)
    c_pad = ((C + 127) // 128) * 128

    def row(b):
        return b.reshape(1, -1).astype(jnp.float32)

    wqkv, bqkv, wo, wi, bi, wo2, vecs = [], [], [], [], [], [], []
    for lyr in params["layers"]:
        wq_s = lyr["wq"] * scale                       # fold 1/sqrt(d) into Q projection
        bq_s = lyr["bq"] * scale
        wqkv.append(jnp.concatenate([wq_s, lyr["wk"], lyr["wv"]], axis=1).astype(MM_DTYPE))
        bqkv.append(jnp.concatenate([bq_s, lyr["bk"], lyr["bv"]]).reshape(1, -1)
                    .astype(jnp.float32))
        wo.append(lyr["wo"].astype(MM_DTYPE))
        wi.append(lyr["wi"].astype(MM_DTYPE))
        bi.append(lyr["bi"].reshape(1, -1).astype(jnp.float32))
        wo2.append(lyr["wo2"].astype(MM_DTYPE))
        vecs.append(jnp.stack([lyr["bo"], lyr["ln1_g"], lyr["ln1_b"],
                               lyr["bo2"], lyr["ln2_g"], lyr["ln2_b"]],
                              axis=0).astype(jnp.float32))

    fc_w = jnp.zeros((H, c_pad), jnp.float32).at[:, :C].set(params["fc_w"])
    fc_b = jnp.zeros((c_pad,), jnp.float32).at[:C].set(params["fc_b"])

    return {
        "word_emb": params["word_emb"].astype(jnp.float32),
        # token_type_ids default to 0 in BertModel when not passed -> fold type_emb[0] here.
        "pos_type": (params["pos_emb"] + params["type_emb"][0][None, :]).astype(jnp.float32),
        "emb_ln_g": row(params["emb_ln_g"]),
        "emb_ln_b": row(params["emb_ln_b"]),
        "wqkv_all": jnp.stack(wqkv),                   # (L, H, 3H) bf16
        "bqkv_all": jnp.stack(bqkv),                   # (L, 1, 3H) f32
        "wo_all": jnp.stack(wo),                       # (L, H, H)  bf16
        "wi_all": jnp.stack(wi),                       # (L, H, I)  bf16
        "bi_all": jnp.stack(bi),                       # (L, 1, I)  f32
        "wo2_all": jnp.stack(wo2),                     # (L, I, H)  bf16
        "vecs_all": jnp.stack(vecs),                   # (L, 6, H)  f32
        "pool_w": params["pool_w"].astype(jnp.float32),
        "pool_b": row(params["pool_b"]),
        "fc_w": fc_w,                                  # (H, 128)   f32
        "fc_b": fc_b.reshape(1, -1),                   # (1, 128)   f32
    }


def bert_classifier_forward(prep, input_ids, attention_mask, cfg):
    B, S = input_ids.shape
    H, L, nH = cfg["hidden"], cfg["num_layers"], cfg["num_heads"]
    I = prep["wi_all"].shape[-1]
    H3 = 3 * H
    c_pad = prep["fc_w"].shape[1]

    # Additive attention-mask bias precomputed once: 0 keep / -1e9 pad, (B, 1, S).
    mask_bias = jnp.where(attention_mask[:, None, :] > 0, 0.0, -1e9).astype(jnp.float32)
    # Vocab gather stays in XLA; the add + LayerNorm happen inside the fused kernel.
    word = jnp.take(prep["word_emb"], input_ids, axis=0)          # (B, S, H) f32
    pos_type = prep["pos_type"][:S]                               # (S, H) f32

    kernel = functools.partial(_fused_bert_kernel, num_layers=L, num_heads=nH,
                               head_dim=H // nH, eps=LN_EPS)

    logits_padded = pl.pallas_call(
        kernel,
        out_shape=jax.ShapeDtypeStruct((B, 1, c_pad), jnp.float32),
        grid=(B,),
        in_specs=[
            pl.BlockSpec((None, S, H), lambda b: (b, 0, 0)),      # gathered word embeddings
            pl.BlockSpec((S, H), lambda b: (0, 0)),               # pos + type-0 embeddings
            pl.BlockSpec((None, 1, S), lambda b: (b, 0, 0)),      # attention mask bias
            pl.BlockSpec((1, H), lambda b: (0, 0)),               # embed LN gamma
            pl.BlockSpec((1, H), lambda b: (0, 0)),               # embed LN beta
            pl.BlockSpec((L, H, H3), lambda b: (0, 0, 0)),        # stacked W_qkv
            pl.BlockSpec((L, 1, H3), lambda b: (0, 0, 0)),        # stacked b_qkv
            pl.BlockSpec((L, H, H), lambda b: (0, 0, 0)),         # stacked W_o
            pl.BlockSpec((L, H, I), lambda b: (0, 0, 0)),         # stacked W_i
            pl.BlockSpec((L, 1, I), lambda b: (0, 0, 0)),         # stacked b_i
            pl.BlockSpec((L, I, H), lambda b: (0, 0, 0)),         # stacked W_o2
            pl.BlockSpec((L, 6, H), lambda b: (0, 0, 0)),         # bundled bias/LN vectors
            pl.BlockSpec((H, H), lambda b: (0, 0)),               # pooler W
            pl.BlockSpec((1, H), lambda b: (0, 0)),               # pooler b
            pl.BlockSpec((H, c_pad), lambda b: (0, 0)),           # classifier W (padded)
            pl.BlockSpec((1, c_pad), lambda b: (0, 0)),           # classifier b (padded)
        ],
        out_specs=pl.BlockSpec((None, 1, c_pad), lambda b: (b, 0, 0)),
        compiler_params=pltpu.CompilerParams(dimension_semantics=("parallel",)),
    )(word, pos_type, mask_bias,
      prep["emb_ln_g"], prep["emb_ln_b"],
      prep["wqkv_all"], prep["bqkv_all"], prep["wo_all"],
      prep["wi_all"], prep["bi_all"], prep["wo2_all"], prep["vecs_all"],
      prep["pool_w"], prep["pool_b"], prep["fc_w"], prep["fc_b"])

    return logits_padded[:, 0, :cfg["num_classes"]]


# ---------------------------- driver ----------------------------

if __name__ == "__main__":
    cfg = CFG
    B, S = 2, 8
    key = jax.random.PRNGKey(0)
    pkey, ikey = jax.random.split(key)

    params = init_params(pkey, cfg)
    prep = prepare_params(params, cfg)

    input_ids = jax.random.randint(ikey, (B, S), 0, cfg["vocab_size"], dtype=jnp.int32)
    attention_mask = jnp.array([[1, 1, 1, 1, 1, 1, 1, 1],
                                [1, 1, 1, 1, 1, 1, 0, 0]], dtype=jnp.int32)

    fwd = jax.jit(functools.partial(bert_classifier_forward, cfg=cfg))
    logits = fwd(prep, input_ids, attention_mask)
    jax.block_until_ready(logits)
    assert logits.shape == (B, cfg["num_classes"])
    assert bool(jnp.all(jnp.isfinite(logits)))
    print("KERNEL_OK")
</pallas_src>

<mosaic_0001>
module attributes {stable_mosaic.version = 11 : i64} {
  func.func @_fused_bert_kernel(%arg0: i32, %arg1: memref<1x8x32xf32, #tpu.memory_space<vmem>>, %arg2: memref<8x32xf32, #tpu.memory_space<vmem>>, %arg3: memref<1x1x8xf32, #tpu.memory_space<vmem>>, %arg4: memref<1x32xf32, #tpu.memory_space<vmem>>, %arg5: memref<1x32xf32, #tpu.memory_space<vmem>>, %arg6: memref<2x32x96xbf16, #tpu.memory_space<vmem>>, %arg7: memref<2x1x96xf32, #tpu.memory_space<vmem>>, %arg8: memref<2x32x32xbf16, #tpu.memory_space<vmem>>, %arg9: memref<2x32x64xbf16, #tpu.memory_space<vmem>>, %arg10: memref<2x1x64xf32, #tpu.memory_space<vmem>>, %arg11: memref<2x64x32xbf16, #tpu.memory_space<vmem>>, %arg12: memref<2x6x32xf32, #tpu.memory_space<vmem>>, %arg13: memref<32x32xf32, #tpu.memory_space<vmem>>, %arg14: memref<1x32xf32, #tpu.memory_space<vmem>>, %arg15: memref<32x128xf32, #tpu.memory_space<vmem>>, %arg16: memref<1x128xf32, #tpu.memory_space<vmem>>, %arg17: memref<1x1x128xf32, #tpu.memory_space<vmem>>) attributes {dimension_semantics = [#tpu.dimension_semantics<parallel>], iteration_bounds = array<i64: 2>, scalar_prefetch = 0 : i64, scratch_operands = 0 : i64, tpu.core_type = #tpu.core_type<tc>, window_params = [{transform_indices = @transform_0, window_bounds = array<i64: 1, 8, 32>}, {pipeline_mode = #tpu.pipeline_mode<synchronous>, transform_indices = @transform_1, window_bounds = array<i64: 8, 32>}, {transform_indices = @transform_2, window_bounds = array<i64: 1, 1, 8>}, {pipeline_mode = #tpu.pipeline_mode<synchronous>, transform_indices = @transform_3, window_bounds = array<i64: 1, 32>}, {pipeline_mode = #tpu.pipeline_mode<synchronous>, transform_indices = @transform_4, window_bounds = array<i64: 1, 32>}, {pipeline_mode = #tpu.pipeline_mode<synchronous>, transform_indices = @transform_5, window_bounds = array<i64: 2, 32, 96>}, {pipeline_mode = #tpu.pipeline_mode<synchronous>, transform_indices = @transform_6, window_bounds = array<i64: 2, 1, 96>}, {pipeline_mode = #tpu.pipeline_mode<synchronous>, transform_indices = @transform_7, window_bounds = array<i64: 2, 32, 32>}, {pipeline_mode = #tpu.pipeline_mode<synchronous>, transform_indices = @transform_8, window_bounds = array<i64: 2, 32, 64>}, {pipeline_mode = #tpu.pipeline_mode<synchronous>, transform_indices = @transform_9, window_bounds = array<i64: 2, 1, 64>}, {pipeline_mode = #tpu.pipeline_mode<synchronous>, transform_indices = @transform_10, window_bounds = array<i64: 2, 64, 32>}, {pipeline_mode = #tpu.pipeline_mode<synchronous>, transform_indices = @transform_11, window_bounds = array<i64: 2, 6, 32>}, {pipeline_mode = #tpu.pipeline_mode<synchronous>, transform_indices = @transform_12, window_bounds = array<i64: 32, 32>}, {pipeline_mode = #tpu.pipeline_mode<synchronous>, transform_indices = @transform_13, window_bounds = array<i64: 1, 32>}, {pipeline_mode = #tpu.pipeline_mode<synchronous>, transform_indices = @transform_14, window_bounds = array<i64: 32, 128>}, {pipeline_mode = #tpu.pipeline_mode<synchronous>, transform_indices = @transform_15, window_bounds = array<i64: 1, 128>}, {transform_indices = @transform_16, window_bounds = array<i64: 1, 1, 128>}]} {
    %c0 = arith.constant 0 : index
    %c0_0 = arith.constant 0 : index
    %c0_1 = arith.constant 0 : index
    %0 = vector.load %arg1[%c0, %c0_0, %c0_1] : memref<1x8x32xf32, #tpu.memory_space<vmem>>, vector<1x8x32xf32>
    %1 = vector.shape_cast %0 : vector<1x8x32xf32> to vector<8x32xf32>
    %c0_2 = arith.constant 0 : index
    %c0_3 = arith.constant 0 : index
    %2 = vector.load %arg2[%c0_2, %c0_3] : memref<8x32xf32, #tpu.memory_space<vmem>>, vector<8x32xf32>
    %3 = arith.addf %1, %2 : vector<8x32xf32>
    %c0_4 = arith.constant 0 : index
    %c0_5 = arith.constant 0 : index
    %4 = vector.load %arg4[%c0_4, %c0_5] : memref<1x32xf32, #tpu.memory_space<vmem>>, vector<1x32xf32>
    %c0_6 = arith.constant 0 : index
    %c0_7 = arith.constant 0 : index
    %5 = vector.load %arg5[%c0_6, %c0_7] : memref<1x32xf32, #tpu.memory_space<vmem>>, vector<1x32xf32>
    %cst = arith.constant dense<0.000000e+00> : vector<8xf32>
    %6 = vector.multi_reduction <add>, %3, %cst [1] : vector<8x32xf32> to vector<8xf32>
    %7 = vector.shape_cast %6 : vector<8xf32> to vector<8x1xf32>
    %cst_8 = arith.constant 3.200000e+01 : f32
    %8 = vector.broadcast %cst_8 : f32 to vector<8x1xf32>
    %9 = arith.divf %7, %8 : vector<8x1xf32>
    %10 = vector.broadcast %9 : vector<8x1xf32> to vector<8x32xf32>
    %11 = arith.subf %3, %10 : vector<8x32xf32>
    %12 = arith.mulf %11, %11 : vector<8x32xf32>
    %cst_9 = arith.constant dense<0.000000e+00> : vector<8xf32>
    %13 = vector.multi_reduction <add>, %12, %cst_9 [1] : vector<8x32xf32> to vector<8xf32>
    %14 = vector.shape_cast %13 : vector<8xf32> to vector<8x1xf32>
    %cst_10 = arith.constant 3.200000e+01 : f32
    %15 = vector.broadcast %cst_10 : f32 to vector<8x1xf32>
    %16 = arith.divf %14, %15 : vector<8x1xf32>
    %17 = vector.broadcast %9 : vector<8x1xf32> to vector<8x32xf32>
    %18 = arith.subf %3, %17 : vector<8x32xf32>
    %cst_11 = arith.constant 9.99999996E-13 : f32
    %19 = vector.broadcast %cst_11 : f32 to vector<8x1xf32>
    %20 = arith.addf %16, %19 : vector<8x1xf32>
    %21 = math.rsqrt %20 : vector<8x1xf32>
    %22 = vector.broadcast %21 : vector<8x1xf32> to vector<8x32xf32>
    %23 = arith.mulf %18, %22 : vector<8x32xf32>
    %24 = vector.broadcast %4 : vector<1x32xf32> to vector<8x32xf32>
    %25 = arith.mulf %23, %24 : vector<8x32xf32>
    %26 = vector.broadcast %5 : vector<1x32xf32> to vector<8x32xf32>
    %27 = arith.addf %25, %26 : vector<8x32xf32>
    %28 = arith.truncf %27 : vector<8x32xf32> to vector<8x32xbf16>
    %c0_12 = arith.constant 0 : index
    %c0_13 = arith.constant 0 : index
    %c0_14 = arith.constant 0 : index
    %29 = vector.load %arg3[%c0_12, %c0_13, %c0_14] : memref<1x1x8xf32, #tpu.memory_space<vmem>>, vector<1x1x8xf32>
    %30 = vector.shape_cast %29 : vector<1x1x8xf32> to vector<1x8xf32>
    %c0_15 = arith.constant 0 : index
    %c0_16 = arith.constant 0 : index
    %c0_17 = arith.constant 0 : index
    %31 = vector.load %arg12[%c0_15, %c0_16, %c0_17] : memref<2x6x32xf32, #tpu.memory_space<vmem>>, vector<1x6x32xf32>
    %32 = vector.shape_cast %31 : vector<1x6x32xf32> to vector<6x32xf32>
    %33 = vector.extract_strided_slice %32 {offsets = [0, 0], sizes = [1, 32], strides = [1, 1]} : vector<6x32xf32> to vector<1x32xf32>
    %34 = vector.extract_strided_slice %32 {offsets = [1, 0], sizes = [1, 32], strides = [1, 1]} : vector<6x32xf32> to vector<1x32xf32>
    %35 = vector.extract_strided_slice %32 {offsets = [2, 0], sizes = [1, 32], strides = [1, 1]} : vector<6x32xf32> to vector<1x32xf32>
    %36 = vector.extract_strided_slice %32 {offsets = [3, 0], sizes = [1, 32], strides = [1, 1]} : vector<6x32xf32> to vector<1x32xf32>
    %37 = vector.extract_strided_slice %32 {offsets = [4, 0], sizes = [1, 32], strides = [1, 1]} : vector<6x32xf32> to vector<1x32xf32>
    %38 = vector.extract_strided_slice %32 {offsets = [5, 0], sizes = [1, 32], strides = [1, 1]} : vector<6x32xf32> to vector<1x32xf32>
    %c0_18 = arith.constant 0 : index
    %c0_19 = arith.constant 0 : index
    %c0_20 = arith.constant 0 : index
    %39 = vector.load %arg6[%c0_18, %c0_19, %c0_20] : memref<2x32x96xbf16, #tpu.memory_space<vmem>>, vector<1x32x96xbf16>
    %40 = vector.shape_cast %39 : vector<1x32x96xbf16> to vector<32x96xbf16>
    %cst_21 = arith.constant dense<0.000000e+00> : vector<8x96xf32>
    %41 = tpu.matmul %28, %40, %cst_21 {dimension_numbers = #tpu.dot_dimension_numbers<[1], [0], [0], [1], [0, 0, 1, 1], [], []>} : vector<8x32xbf16>, vector<32x96xbf16>, vector<8x96xf32> -> vector<8x96xf32>
    %c0_22 = arith.constant 0 : index
    %c0_23 = arith.constant 0 : index
    %c0_24 = arith.constant 0 : index
    %42 = vector.load %arg7[%c0_22, %c0_23, %c0_24] : memref<2x1x96xf32, #tpu.memory_space<vmem>>, vector<1x1x96xf32>
    %43 = vector.shape_cast %42 : vector<1x1x96xf32> to vector<1x96xf32>
    %44 = vector.broadcast %43 : vector<1x96xf32> to vector<8x96xf32>
    %45 = arith.addf %41, %44 : vector<8x96xf32>
    %46 = arith.truncf %45 : vector<8x96xf32> to vector<8x96xbf16>
    %c0_25 = arith.constant 0 : index
    %c0_26 = arith.constant 0 : index
    %c0_27 = arith.constant 0 : index
    %47 = vector.load %arg8[%c0_25, %c0_26, %c0_27] : memref<2x32x32xbf16, #tpu.memory_space<vmem>>, vector<1x32x32xbf16>
    %48 = vector.shape_cast %47 : vector<1x32x32xbf16> to vector<32x32xbf16>
    %cst_28 = arith.constant 0.000000e+00 : f32
    %49 = vector.broadcast %cst_28 : f32 to vector<8x32xf32>
    %50 = vector.extract_strided_slice %46 {offsets = [0, 0], sizes = [8, 16], strides = [1, 1]} : vector<8x96xbf16> to vector<8x16xbf16>
    %51 = vector.extract_strided_slice %46 {offsets = [0, 32], sizes = [8, 16], strides = [1, 1]} : vector<8x96xbf16> to vector<8x16xbf16>
    %52 = vector.extract_strided_slice %46 {offsets = [0, 64], sizes = [8, 16], strides = [1, 1]} : vector<8x96xbf16> to vector<8x16xbf16>
    %cst_29 = arith.constant dense<0.000000e+00> : vector<8x8xf32>
    %53 = tpu.matmul %50, %51, %cst_29 {dimension_numbers = #tpu.dot_dimension_numbers<[1], [1], [0], [0], [0, 0, 1, 0], [], []>} : vector<8x16xbf16>, vector<8x16xbf16>, vector<8x8xf32> -> vector<8x8xf32>
    %54 = vector.broadcast %30 : vector<1x8xf32> to vector<8x8xf32>
    %55 = arith.addf %53, %54 : vector<8x8xf32>
    %cst_30 = arith.constant dense<0xFF800000> : vector<8xf32>
    %56 = vector.multi_reduction <maximumf>, %55, %cst_30 [1] : vector<8x8xf32> to vector<8xf32>
    %57 = vector.shape_cast %56 : vector<8xf32> to vector<8x1xf32>
    %58 = vector.broadcast %57 : vector<8x1xf32> to vector<8x8xf32>
    %59 = arith.subf %55, %58 : vector<8x8xf32>
    %60 = math.exp %59 : vector<8x8xf32>
    %cst_31 = arith.constant dense<0.000000e+00> : vector<8xf32>
    %61 = vector.multi_reduction <add>, %60, %cst_31 [1] : vector<8x8xf32> to vector<8xf32>
    %62 = vector.shape_cast %61 : vector<8xf32> to vector<8x1xf32>
    %63 = vector.broadcast %62 : vector<8x1xf32> to vector<8x8xf32>
    %64 = arith.divf %60, %63 : vector<8x8xf32>
    %65 = arith.truncf %64 : vector<8x8xf32> to vector<8x8xbf16>
    %cst_32 = arith.constant dense<0.000000e+00> : vector<8x16xf32>
    %66 = tpu.matmul %65, %52, %cst_32 {dimension_numbers = #tpu.dot_dimension_numbers<[1], [0], [0], [1], [0, 0, 1, 1], [], []>} : vector<8x8xbf16>, vector<8x16xbf16>, vector<8x16xf32> -> vector<8x16xf32>
    %67 = arith.truncf %66 : vector<8x16xf32> to vector<8x16xbf16>
    %68 = vector.extract_strided_slice %48 {offsets = [0, 0], sizes = [16, 32], strides = [1, 1]} : vector<32x32xbf16> to vector<16x32xbf16>
    %cst_33 = arith.constant dense<0.000000e+00> : vector<8x32xf32>
    %69 = tpu.matmul %67, %68, %cst_33 {dimension_numbers = #tpu.dot_dimension_numbers<[1], [0], [0], [1], [0, 0, 1, 1], [], []>} : vector<8x16xbf16>, vector<16x32xbf16>, vector<8x32xf32> -> vector<8x32xf32>
    %70 = arith.addf %49, %69 : vector<8x32xf32>
    %71 = vector.extract_strided_slice %46 {offsets = [0, 16], sizes = [8, 16], strides = [1, 1]} : vector<8x96xbf16> to vector<8x16xbf16>
    %72 = vector.extract_strided_slice %46 {offsets = [0, 48], sizes = [8, 16], strides = [1, 1]} : vector<8x96xbf16> to vector<8x16xbf16>
    %73 = vector.extract_strided_slice %46 {offsets = [0, 80], sizes = [8, 16], strides = [1, 1]} : vector<8x96xbf16> to vector<8x16xbf16>
    %cst_34 = arith.constant dense<0.000000e+00> : vector<8x8xf32>
    %74 = tpu.matmul %71, %72, %cst_34 {dimension_numbers = #tpu.dot_dimension_numbers<[1], [1], [0], [0], [0, 0, 1, 0], [], []>} : vector<8x16xbf16>, vector<8x16xbf16>, vector<8x8xf32> -> vector<8x8xf32>
    %75 = vector.broadcast %30 : vector<1x8xf32> to vector<8x8xf32>
    %76 = arith.addf %74, %75 : vector<8x8xf32>
    %cst_35 = arith.constant dense<0xFF800000> : vector<8xf32>
    %77 = vector.multi_reduction <maximumf>, %76, %cst_35 [1] : vector<8x8xf32> to vector<8xf32>
    %78 = vector.shape_cast %77 : vector<8xf32> to vector<8x1xf32>
    %79 = vector.broadcast %78 : vector<8x1xf32> to vector<8x8xf32>
    %80 = arith.subf %76, %79 : vector<8x8xf32>
    %81 = math.exp %80 : vector<8x8xf32>
    %cst_36 = arith.constant dense<0.000000e+00> : vector<8xf32>
    %82 = vector.multi_reduction <add>, %81, %cst_36 [1] : vector<8x8xf32> to vector<8xf32>
    %83 = vector.shape_cast %82 : vector<8xf32> to vector<8x1xf32>
    %84 = vector.broadcast %83 : vector<8x1xf32> to vector<8x8xf32>
    %85 = arith.divf %81, %84 : vector<8x8xf32>
    %86 = arith.truncf %85 : vector<8x8xf32> to vector<8x8xbf16>
    %cst_37 = arith.constant dense<0.000000e+00> : vector<8x16xf32>
    %87 = tpu.matmul %86, %73, %cst_37 {dimension_numbers = #tpu.dot_dimension_numbers<[1], [0], [0], [1], [0, 0, 1, 1], [], []>} : vector<8x8xbf16>, vector<8x16xbf16>, vector<8x16xf32> -> vector<8x16xf32>
    %88 = arith.truncf %87 : vector<8x16xf32> to vector<8x16xbf16>
    %89 = vector.extract_strided_slice %48 {offsets = [16, 0], sizes = [16, 32], strides = [1, 1]} : vector<32x32xbf16> to vector<16x32xbf16>
    %cst_38 = arith.constant dense<0.000000e+00> : vector<8x32xf32>
    %90 = tpu.matmul %88, %89, %cst_38 {dimension_numbers = #tpu.dot_dimension_numbers<[1], [0], [0], [1], [0, 0, 1, 1], [], []>} : vector<8x16xbf16>, vector<16x32xbf16>, vector<8x32xf32> -> vector<8x32xf32>
    %91 = arith.addf %70, %90 : vector<8x32xf32>
    %92 = vector.broadcast %33 : vector<1x32xf32> to vector<8x32xf32>
    %93 = arith.addf %91, %92 : vector<8x32xf32>
    %94 = arith.extf %28 : vector<8x32xbf16> to vector<8x32xf32>
    %95 = arith.addf %93, %94 : vector<8x32xf32>
    %cst_39 = arith.constant dense<0.000000e+00> : vector<8xf32>
    %96 = vector.multi_reduction <add>, %95, %cst_39 [1] : vector<8x32xf32> to vector<8xf32>
    %97 = vector.shape_cast %96 : vector<8xf32> to vector<8x1xf32>
    %cst_40 = arith.constant 3.200000e+01 : f32
    %98 = vector.broadcast %cst_40 : f32 to vector<8x1xf32>
    %99 = arith.divf %97, %98 : vector<8x1xf32>
    %100 = vector.broadcast %99 : vector<8x1xf32> to vector<8x32xf32>
    %101 = arith.subf %95, %100 : vector<8x32xf32>
    %102 = arith.mulf %101, %101 : vector<8x32xf32>
    %cst_41 = arith.constant dense<0.000000e+00> : vector<8xf32>
    %103 = vector.multi_reduction <add>, %102, %cst_41 [1] : vector<8x32xf32> to vector<8xf32>
    %104 = vector.shape_cast %103 : vector<8xf32> to vector<8x1xf32>
    %cst_42 = arith.constant 3.200000e+01 : f32
    %105 = vector.broadcast %cst_42 : f32 to vector<8x1xf32>
    %106 = arith.divf %104, %105 : vector<8x1xf32>
    %107 = vector.broadcast %99 : vector<8x1xf32> to vector<8x32xf32>
    %108 = arith.subf %95, %107 : vector<8x32xf32>
    %cst_43 = arith.constant 9.99999996E-13 : f32
    %109 = vector.broadcast %cst_43 : f32 to vector<8x1xf32>
    %110 = arith.addf %106, %109 : vector<8x1xf32>
    %111 = math.rsqrt %110 : vector<8x1xf32>
    %112 = vector.broadcast %111 : vector<8x1xf32> to vector<8x32xf32>
    %113 = arith.mulf %108, %112 : vector<8x32xf32>
    %114 = vector.broadcast %34 : vector<1x32xf32> to vector<8x32xf32>
    %115 = arith.mulf %113, %114 : vector<8x32xf32>
    %116 = vector.broadcast %35 : vector<1x32xf32> to vector<8x32xf32>
    %117 = arith.addf %115, %116 : vector<8x32xf32>
    %118 = arith.truncf %117 : vector<8x32xf32> to vector<8x32xbf16>
    %c0_44 = arith.constant 0 : index
    %c0_45 = arith.constant 0 : index
    %c0_46 = arith.constant 0 : index
    %119 = vector.load %arg9[%c0_44, %c0_45, %c0_46] : memref<2x32x64xbf16, #tpu.memory_space<vmem>>, vector<1x32x64xbf16>
    %120 = vector.shape_cast %119 : vector<1x32x64xbf16> to vector<32x64xbf16>
    %cst_47 = arith.constant dense<0.000000e+00> : vector<8x64xf32>
    %121 = tpu.matmul %118, %120, %cst_47 {dimension_numbers = #tpu.dot_dimension_numbers<[1], [0], [0], [1], [0, 0, 1, 1], [], []>} : vector<8x32xbf16>, vector<32x64xbf16>, vector<8x64xf32> -> vector<8x64xf32>
    %c0_48 = arith.constant 0 : index
    %c0_49 = arith.constant 0 : index
    %c0_50 = arith.constant 0 : index
    %122 = vector.load %arg10[%c0_48, %c0_49, %c0_50] : memref<2x1x64xf32, #tpu.memory_space<vmem>>, vector<1x1x64xf32>
    %123 = vector.shape_cast %122 : vector<1x1x64xf32> to vector<1x64xf32>
    %124 = vector.broadcast %123 : vector<1x64xf32> to vector<8x64xf32>
    %125 = arith.addf %121, %124 : vector<8x64xf32>
    %cst_51 = arith.constant 5.000000e-01 : f32
    %126 = vector.broadcast %cst_51 : f32 to vector<8x64xf32>
    %127 = arith.mulf %126, %125 : vector<8x64xf32>
    %cst_52 = arith.constant 0.707106769 : f32
    %128 = vector.broadcast %cst_52 : f32 to vector<8x64xf32>
    %129 = arith.mulf %125, %128 : vector<8x64xf32>
    %130 = math.erf %129 : vector<8x64xf32>
    %cst_53 = arith.constant 1.000000e+00 : f32
    %131 = vector.broadcast %cst_53 : f32 to vector<8x64xf32>
    %132 = arith.addf %131, %130 : vector<8x64xf32>
    %133 = arith.mulf %127, %132 : vector<8x64xf32>
    %134 = arith.truncf %133 : vector<8x64xf32> to vector<8x64xbf16>
    %c0_54 = arith.constant 0 : index
    %c0_55 = arith.constant 0 : index
    %c0_56 = arith.constant 0 : index
    %135 = vector.load %arg11[%c0_54, %c0_55, %c0_56] : memref<2x64x32xbf16, #tpu.memory_space<vmem>>, vector<1x64x32xbf16>
    %136 = vector.shape_cast %135 : vector<1x64x32xbf16> to vector<64x32xbf16>
    %cst_57 = arith.constant dense<0.000000e+00> : vector<8x32xf32>
    %137 = tpu.matmul %134, %136, %cst_57 {dimension_numbers = #tpu.dot_dimension_numbers<[1], [0], [0], [1], [0, 0, 1, 1], [], []>} : vector<8x64xbf16>, vector<64x32xbf16>, vector<8x32xf32> -> vector<8x32xf32>
    %138 = vector.broadcast %36 : vector<1x32xf32> to vector<8x32xf32>
    %139 = arith.addf %137, %138 : vector<8x32xf32>
    %140 = arith.addf %139, %117 : vector<8x32xf32>
    %cst_58 = arith.constant dense<0.000000e+00> : vector<8xf32>
    %141 = vector.multi_reduction <add>, %140, %cst_58 [1] : vector<8x32xf32> to vector<8xf32>
    %142 = vector.shape_cast %141 : vector<8xf32> to vector<8x1xf32>
    %cst_59 = arith.constant 3.200000e+01 : f32
    %143 = vector.broadcast %cst_59 : f32 to vector<8x1xf32>
    %144 = arith.divf %142, %143 : vector<8x1xf32>
    %145 = vector.broadcast %144 : vector<8x1xf32> to vector<8x32xf32>
    %146 = arith.subf %140, %145 : vector<8x32xf32>
    %147 = arith.mulf %146, %146 : vector<8x32xf32>
    %cst_60 = arith.constant dense<0.000000e+00> : vector<8xf32>
    %148 = vector.multi_reduction <add>, %147, %cst_60 [1] : vector<8x32xf32> to vector<8xf32>
    %149 = vector.shape_cast %148 : vector<8xf32> to vector<8x1xf32>
    %cst_61 = arith.constant 3.200000e+01 : f32
    %150 = vector.broadcast %cst_61 : f32 to vector<8x1xf32>
    %151 = arith.divf %149, %150 : vector<8x1xf32>
    %152 = vector.broadcast %144 : vector<8x1xf32> to vector<8x32xf32>
    %153 = arith.subf %140, %152 : vector<8x32xf32>
    %cst_62 = arith.constant 9.99999996E-13 : f32
    %154 = vector.broadcast %cst_62 : f32 to vector<8x1xf32>
    %155 = arith.addf %151, %154 : vector<8x1xf32>
    %156 = math.rsqrt %155 : vector<8x1xf32>
    %157 = vector.broadcast %156 : vector<8x1xf32> to vector<8x32xf32>
    %158 = arith.mulf %153, %157 : vector<8x32xf32>
    %159 = vector.broadcast %37 : vector<1x32xf32> to vector<8x32xf32>
    %160 = arith.mulf %158, %159 : vector<8x32xf32>
    %161 = vector.broadcast %38 : vector<1x32xf32> to vector<8x32xf32>
    %162 = arith.addf %160, %161 : vector<8x32xf32>
    %163 = arith.truncf %162 : vector<8x32xf32> to vector<8x32xbf16>
    %c1 = arith.constant 1 : index
    %c0_63 = arith.constant 0 : index
    %c0_64 = arith.constant 0 : index
    %164 = vector.load %arg12[%c1, %c0_63, %c0_64] : memref<2x6x32xf32, #tpu.memory_space<vmem>>, vector<1x6x32xf32>
    %165 = vector.shape_cast %164 : vector<1x6x32xf32> to vector<6x32xf32>
    %166 = vector.extract_strided_slice %165 {offsets = [0, 0], sizes = [1, 32], strides = [1, 1]} : vector<6x32xf32> to vector<1x32xf32>
    %167 = vector.extract_strided_slice %165 {offsets = [1, 0], sizes = [1, 32], strides = [1, 1]} : vector<6x32xf32> to vector<1x32xf32>
    %168 = vector.extract_strided_slice %165 {offsets = [2, 0], sizes = [1, 32], strides = [1, 1]} : vector<6x32xf32> to vector<1x32xf32>
    %169 = vector.extract_strided_slice %165 {offsets = [3, 0], sizes = [1, 32], strides = [1, 1]} : vector<6x32xf32> to vector<1x32xf32>
    %170 = vector.extract_strided_slice %165 {offsets = [4, 0], sizes = [1, 32], strides = [1, 1]} : vector<6x32xf32> to vector<1x32xf32>
    %171 = vector.extract_strided_slice %165 {offsets = [5, 0], sizes = [1, 32], strides = [1, 1]} : vector<6x32xf32> to vector<1x32xf32>
    %c1_65 = arith.constant 1 : index
    %c0_66 = arith.constant 0 : index
    %c0_67 = arith.constant 0 : index
    %172 = vector.load %arg6[%c1_65, %c0_66, %c0_67] : memref<2x32x96xbf16, #tpu.memory_space<vmem>>, vector<1x32x96xbf16>
    %173 = vector.shape_cast %172 : vector<1x32x96xbf16> to vector<32x96xbf16>
    %cst_68 = arith.constant dense<0.000000e+00> : vector<8x96xf32>
    %174 = tpu.matmul %163, %173, %cst_68 {dimension_numbers = #tpu.dot_dimension_numbers<[1], [0], [0], [1], [0, 0, 1, 1], [], []>} : vector<8x32xbf16>, vector<32x96xbf16>, vector<8x96xf32> -> vector<8x96xf32>
    %c1_69 = arith.constant 1 : index
    %c0_70 = arith.constant 0 : index
    %c0_71 = arith.constant 0 : index
    %175 = vector.load %arg7[%c1_69, %c0_70, %c0_71] : memref<2x1x96xf32, #tpu.memory_space<vmem>>, vector<1x1x96xf32>
    %176 = vector.shape_cast %175 : vector<1x1x96xf32> to vector<1x96xf32>
    %177 = vector.broadcast %176 : vector<1x96xf32> to vector<8x96xf32>
    %178 = arith.addf %174, %177 : vector<8x96xf32>
    %179 = arith.truncf %178 : vector<8x96xf32> to vector<8x96xbf16>
    %c1_72 = arith.constant 1 : index
    %c0_73 = arith.constant 0 : index
    %c0_74 = arith.constant 0 : index
    %180 = vector.load %arg8[%c1_72, %c0_73, %c0_74] : memref<2x32x32xbf16, #tpu.memory_space<vmem>>, vector<1x32x32xbf16>
    %181 = vector.shape_cast %180 : vector<1x32x32xbf16> to vector<32x32xbf16>
    %cst_75 = arith.constant 0.000000e+00 : f32
    %182 = vector.broadcast %cst_75 : f32 to vector<8x32xf32>
    %183 = vector.extract_strided_slice %179 {offsets = [0, 0], sizes = [8, 16], strides = [1, 1]} : vector<8x96xbf16> to vector<8x16xbf16>
    %184 = vector.extract_strided_slice %179 {offsets = [0, 32], sizes = [8, 16], strides = [1, 1]} : vector<8x96xbf16> to vector<8x16xbf16>
    %185 = vector.extract_strided_slice %179 {offsets = [0, 64], sizes = [8, 16], strides = [1, 1]} : vector<8x96xbf16> to vector<8x16xbf16>
    %cst_76 = arith.constant dense<0.000000e+00> : vector<8x8xf32>
    %186 = tpu.matmul %183, %184, %cst_76 {dimension_numbers = #tpu.dot_dimension_numbers<[1], [1], [0], [0], [0, 0, 1, 0], [], []>} : vector<8x16xbf16>, vector<8x16xbf16>, vector<8x8xf32> -> vector<8x8xf32>
    %187 = vector.broadcast %30 : vector<1x8xf32> to vector<8x8xf32>
    %188 = arith.addf %186, %187 : vector<8x8xf32>
    %cst_77 = arith.constant dense<0xFF800000> : vector<8xf32>
    %189 = vector.multi_reduction <maximumf>, %188, %cst_77 [1] : vector<8x8xf32> to vector<8xf32>
    %190 = vector.shape_cast %189 : vector<8xf32> to vector<8x1xf32>
    %191 = vector.broadcast %190 : vector<8x1xf32> to vector<8x8xf32>
    %192 = arith.subf %188, %191 : vector<8x8xf32>
    %193 = math.exp %192 : vector<8x8xf32>
    %cst_78 = arith.constant dense<0.000000e+00> : vector<8xf32>
    %194 = vector.multi_reduction <add>, %193, %cst_78 [1] : vector<8x8xf32> to vector<8xf32>
    %195 = vector.shape_cast %194 : vector<8xf32> to vector<8x1xf32>
    %196 = vector.broadcast %195 : vector<8x1xf32> to vector<8x8xf32>
    %197 = arith.divf %193, %196 : vector<8x8xf32>
    %198 = arith.truncf %197 : vector<8x8xf32> to vector<8x8xbf16>
    %cst_79 = arith.constant dense<0.000000e+00> : vector<8x16xf32>
    %199 = tpu.matmul %198, %185, %cst_79 {dimension_numbers = #tpu.dot_dimension_numbers<[1], [0], [0], [1], [0, 0, 1, 1], [], []>} : vector<8x8xbf16>, vector<8x16xbf16>, vector<8x16xf32> -> vector<8x16xf32>
    %200 = arith.truncf %199 : vector<8x16xf32> to vector<8x16xbf16>
    %201 = vector.extract_strided_slice %181 {offsets = [0, 0], sizes = [16, 32], strides = [1, 1]} : vector<32x32xbf16> to vector<16x32xbf16>
    %cst_80 = arith.constant dense<0.000000e+00> : vector<8x32xf32>
    %202 = tpu.matmul %200, %201, %cst_80 {dimension_numbers = #tpu.dot_dimension_numbers<[1], [0], [0], [1], [0, 0, 1, 1], [], []>} : vector<8x16xbf16>, vector<16x32xbf16>, vector<8x32xf32> -> vector<8x32xf32>
    %203 = arith.addf %182, %202 : vector<8x32xf32>
    %204 = vector.extract_strided_slice %179 {offsets = [0, 16], sizes = [8, 16], strides = [1, 1]} : vector<8x96xbf16> to vector<8x16xbf16>
    %205 = vector.extract_strided_slice %179 {offsets = [0, 48], sizes = [8, 16], strides = [1, 1]} : vector<8x96xbf16> to vector<8x16xbf16>
    %206 = vector.extract_strided_slice %179 {offsets = [0, 80], sizes = [8, 16], strides = [1, 1]} : vector<8x96xbf16> to vector<8x16xbf16>
    %cst_81 = arith.constant dense<0.000000e+00> : vector<8x8xf32>
    %207 = tpu.matmul %204, %205, %cst_81 {dimension_numbers = #tpu.dot_dimension_numbers<[1], [1], [0], [0], [0, 0, 1, 0], [], []>} : vector<8x16xbf16>, vector<8x16xbf16>, vector<8x8xf32> -> vector<8x8xf32>
    %208 = vector.broadcast %30 : vector<1x8xf32> to vector<8x8xf32>
    %209 = arith.addf %207, %208 : vector<8x8xf32>
    %cst_82 = arith.constant dense<0xFF800000> : vector<8xf32>
    %210 = vector.multi_reduction <maximumf>, %209, %cst_82 [1] : vector<8x8xf32> to vector<8xf32>
    %211 = vector.shape_cast %210 : vector<8xf32> to vector<8x1xf32>
    %212 = vector.broadcast %211 : vector<8x1xf32> to vector<8x8xf32>
    %213 = arith.subf %209, %212 : vector<8x8xf32>
    %214 = math.exp %213 : vector<8x8xf32>
    %cst_83 = arith.constant dense<0.000000e+00> : vector<8xf32>
    %215 = vector.multi_reduction <add>, %214, %cst_83 [1] : vector<8x8xf32> to vector<8xf32>
    %216 = vector.shape_cast %215 : vector<8xf32> to vector<8x1xf32>
    %217 = vector.broadcast %216 : vector<8x1xf32> to vector<8x8xf32>
    %218 = arith.divf %214, %217 : vector<8x8xf32>
    %219 = arith.truncf %218 : vector<8x8xf32> to vector<8x8xbf16>
    %cst_84 = arith.constant dense<0.000000e+00> : vector<8x16xf32>
    %220 = tpu.matmul %219, %206, %cst_84 {dimension_numbers = #tpu.dot_dimension_numbers<[1], [0], [0], [1], [0, 0, 1, 1], [], []>} : vector<8x8xbf16>, vector<8x16xbf16>, vector<8x16xf32> -> vector<8x16xf32>
    %221 = arith.truncf %220 : vector<8x16xf32> to vector<8x16xbf16>
    %222 = vector.extract_strided_slice %181 {offsets = [16, 0], sizes = [16, 32], strides = [1, 1]} : vector<32x32xbf16> to vector<16x32xbf16>
    %cst_85 = arith.constant dense<0.000000e+00> : vector<8x32xf32>
    %223 = tpu.matmul %221, %222, %cst_85 {dimension_numbers = #tpu.dot_dimension_numbers<[1], [0], [0], [1], [0, 0, 1, 1], [], []>} : vector<8x16xbf16>, vector<16x32xbf16>, vector<8x32xf32> -> vector<8x32xf32>
    %224 = arith.addf %203, %223 : vector<8x32xf32>
    %225 = vector.broadcast %166 : vector<1x32xf32> to vector<8x32xf32>
    %226 = arith.addf %224, %225 : vector<8x32xf32>
    %227 = arith.extf %163 : vector<8x32xbf16> to vector<8x32xf32>
    %228 = arith.addf %226, %227 : vector<8x32xf32>
    %cst_86 = arith.constant dense<0.000000e+00> : vector<8xf32>
    %229 = vector.multi_reduction <add>, %228, %cst_86 [1] : vector<8x32xf32> to vector<8xf32>
    %230 = vector.shape_cast %229 : vector<8xf32> to vector<8x1xf32>
    %cst_87 = arith.constant 3.200000e+01 : f32
    %231 = vector.broadcast %cst_87 : f32 to vector<8x1xf32>
    %232 = arith.divf %230, %231 : vector<8x1xf32>
    %233 = vector.broadcast %232 : vector<8x1xf32> to vector<8x32xf32>
    %234 = arith.subf %228, %233 : vector<8x32xf32>
    %235 = arith.mulf %234, %234 : vector<8x32xf32>
    %cst_88 = arith.constant dense<0.000000e+00> : vector<8xf32>
    %236 = vector.multi_reduction <add>, %235, %cst_88 [1] : vector<8x32xf32> to vector<8xf32>
    %237 = vector.shape_cast %236 : vector<8xf32> to vector<8x1xf32>
    %cst_89 = arith.constant 3.200000e+01 : f32
    %238 = vector.broadcast %cst_89 : f32 to vector<8x1xf32>
    %239 = arith.divf %237, %238 : vector<8x1xf32>
    %240 = vector.broadcast %232 : vector<8x1xf32> to vector<8x32xf32>
    %241 = arith.subf %228, %240 : vector<8x32xf32>
    %cst_90 = arith.constant 9.99999996E-13 : f32
    %242 = vector.broadcast %cst_90 : f32 to vector<8x1xf32>
    %243 = arith.addf %239, %242 : vector<8x1xf32>
    %244 = math.rsqrt %243 : vector<8x1xf32>
    %245 = vector.broadcast %244 : vector<8x1xf32> to vector<8x32xf32>
    %246 = arith.mulf %241, %245 : vector<8x32xf32>
    %247 = vector.broadcast %167 : vector<1x32xf32> to vector<8x32xf32>
    %248 = arith.mulf %246, %247 : vector<8x32xf32>
    %249 = vector.broadcast %168 : vector<1x32xf32> to vector<8x32xf32>
    %250 = arith.addf %248, %249 : vector<8x32xf32>
    %251 = arith.truncf %250 : vector<8x32xf32> to vector<8x32xbf16>
    %c1_91 = arith.constant 1 : index
    %c0_92 = arith.constant 0 : index
    %c0_93 = arith.constant 0 : index
    %252 = vector.load %arg9[%c1_91, %c0_92, %c0_93] : memref<2x32x64xbf16, #tpu.memory_space<vmem>>, vector<1x32x64xbf16>
    %253 = vector.shape_cast %252 : vector<1x32x64xbf16> to vector<32x64xbf16>
    %cst_94 = arith.constant dense<0.000000e+00> : vector<8x64xf32>
    %254 = tpu.matmul %251, %253, %cst_94 {dimension_numbers = #tpu.dot_dimension_numbers<[1], [0], [0], [1], [0, 0, 1, 1], [], []>} : vector<8x32xbf16>, vector<32x64xbf16>, vector<8x64xf32> -> vector<8x64xf32>
    %c1_95 = arith.constant 1 : index
    %c0_96 = arith.constant 0 : index
    %c0_97 = arith.constant 0 : index
    %255 = vector.load %arg10[%c1_95, %c0_96, %c0_97] : memref<2x1x64xf32, #tpu.memory_space<vmem>>, vector<1x1x64xf32>
    %256 = vector.shape_cast %255 : vector<1x1x64xf32> to vector<1x64xf32>
    %257 = vector.broadcast %256 : vector<1x64xf32> to vector<8x64xf32>
    %258 = arith.addf %254, %257 : vector<8x64xf32>
    %cst_98 = arith.constant 5.000000e-01 : f32
    %259 = vector.broadcast %cst_98 : f32 to vector<8x64xf32>
    %260 = arith.mulf %259, %258 : vector<8x64xf32>
    %cst_99 = arith.constant 0.707106769 : f32
    %261 = vector.broadcast %cst_99 : f32 to vector<8x64xf32>
    %262 = arith.mulf %258, %261 : vector<8x64xf32>
    %263 = math.erf %262 : vector<8x64xf32>
    %cst_100 = arith.constant 1.000000e+00 : f32
    %264 = vector.broadcast %cst_100 : f32 to vector<8x64xf32>
    %265 = arith.addf %264, %263 : vector<8x64xf32>
    %266 = arith.mulf %260, %265 : vector<8x64xf32>
    %267 = arith.truncf %266 : vector<8x64xf32> to vector<8x64xbf16>
    %c1_101 = arith.constant 1 : index
    %c0_102 = arith.constant 0 : index
    %c0_103 = arith.constant 0 : index
    %268 = vector.load %arg11[%c1_101, %c0_102, %c0_103] : memref<2x64x32xbf16, #tpu.memory_space<vmem>>, vector<1x64x32xbf16>
    %269 = vector.shape_cast %268 : vector<1x64x32xbf16> to vector<64x32xbf16>
    %cst_104 = arith.constant dense<0.000000e+00> : vector<8x32xf32>
    %270 = tpu.matmul %267, %269, %cst_104 {dimension_numbers = #tpu.dot_dimension_numbers<[1], [0], [0], [1], [0, 0, 1, 1], [], []>} : vector<8x64xbf16>, vector<64x32xbf16>, vector<8x32xf32> -> vector<8x32xf32>
    %271 = vector.broadcast %169 : vector<1x32xf32> to vector<8x32xf32>
    %272 = arith.addf %270, %271 : vector<8x32xf32>
    %273 = arith.addf %272, %250 : vector<8x32xf32>
    %cst_105 = arith.constant dense<0.000000e+00> : vector<8xf32>
    %274 = vector.multi_reduction <add>, %273, %cst_105 [1] : vector<8x32xf32> to vector<8xf32>
    %275 = vector.shape_cast %274 : vector<8xf32> to vector<8x1xf32>
    %cst_106 = arith.constant 3.200000e+01 : f32
    %276 = vector.broadcast %cst_106 : f32 to vector<8x1xf32>
    %277 = arith.divf %275, %276 : vector<8x1xf32>
    %278 = vector.broadcast %277 : vector<8x1xf32> to vector<8x32xf32>
    %279 = arith.subf %273, %278 : vector<8x32xf32>
    %280 = arith.mulf %279, %279 : vector<8x32xf32>
    %cst_107 = arith.constant dense<0.000000e+00> : vector<8xf32>
    %281 = vector.multi_reduction <add>, %280, %cst_107 [1] : vector<8x32xf32> to vector<8xf32>
    %282 = vector.shape_cast %281 : vector<8xf32> to vector<8x1xf32>
    %cst_108 = arith.constant 3.200000e+01 : f32
    %283 = vector.broadcast %cst_108 : f32 to vector<8x1xf32>
    %284 = arith.divf %282, %283 : vector<8x1xf32>
    %285 = vector.broadcast %277 : vector<8x1xf32> to vector<8x32xf32>
    %286 = arith.subf %273, %285 : vector<8x32xf32>
    %cst_109 = arith.constant 9.99999996E-13 : f32
    %287 = vector.broadcast %cst_109 : f32 to vector<8x1xf32>
    %288 = arith.addf %284, %287 : vector<8x1xf32>
    %289 = math.rsqrt %288 : vector<8x1xf32>
    %290 = vector.broadcast %289 : vector<8x1xf32> to vector<8x32xf32>
    %291 = arith.mulf %286, %290 : vector<8x32xf32>
    %292 = vector.broadcast %170 : vector<1x32xf32> to vector<8x32xf32>
    %293 = arith.mulf %291, %292 : vector<8x32xf32>
    %294 = vector.broadcast %171 : vector<1x32xf32> to vector<8x32xf32>
    %295 = arith.addf %293, %294 : vector<8x32xf32>
    %296 = vector.extract_strided_slice %295 {offsets = [0, 0], sizes = [1, 32], strides = [1, 1]} : vector<8x32xf32> to vector<1x32xf32>
    %c0_110 = arith.constant 0 : index
    %c0_111 = arith.constant 0 : index
    %297 = vector.load %arg13[%c0_110, %c0_111] : memref<32x32xf32, #tpu.memory_space<vmem>>, vector<32x32xf32>
    %cst_112 = arith.constant dense<0.000000e+00> : vector<1x32xf32>
    %298 = tpu.matmul %296, %297, %cst_112 {dimension_numbers = #tpu.dot_dimension_numbers<[1], [0], [0], [1], [0, 0, 1, 1], [], []>} : vector<1x32xf32>, vector<32x32xf32>, vector<1x32xf32> -> vector<1x32xf32>
    %c0_113 = arith.constant 0 : index
    %c0_114 = arith.constant 0 : index
    %299 = vector.load %arg14[%c0_113, %c0_114] : memref<1x32xf32, #tpu.memory_space<vmem>>, vector<1x32xf32>
    %300 = arith.addf %298, %299 : vector<1x32xf32>
    %301 = math.tanh %300 : vector<1x32xf32>
    %c0_115 = arith.constant 0 : index
    %c0_116 = arith.constant 0 : index
    %302 = vector.load %arg15[%c0_115, %c0_116] : memref<32x128xf32, #tpu.memory_space<vmem>>, vector<32x128xf32>
    %cst_117 = arith.constant dense<0.000000e+00> : vector<1x128xf32>
    %303 = tpu.matmul %301, %302, %cst_117 {dimension_numbers = #tpu.dot_dimension_numbers<[1], [0], [0], [1], [0, 0, 1, 1], [], []>} : vector<1x32xf32>, vector<32x128xf32>, vector<1x128xf32> -> vector<1x128xf32>
    %c0_118 = arith.constant 0 : index
    %c0_119 = arith.constant 0 : index
    %304 = vector.load %arg16[%c0_118, %c0_119] : memref<1x128xf32, #tpu.memory_space<vmem>>, vector<1x128xf32>
    %305 = arith.addf %303, %304 : vector<1x128xf32>
    %c0_120 = arith.constant 0 : index
    %c0_121 = arith.constant 0 : index
    %c0_122 = arith.constant 0 : index
    %306 = vector.load %arg17[%c0_120, %c0_121, %c0_122] : memref<1x1x128xf32, #tpu.memory_space<vmem>>, vector<1x1x128xf32>
    %307 = vector.shape_cast %306 : vector<1x1x128xf32> to vector<1x128xf32>
    %308 = vector.shape_cast %305 : vector<1x128xf32> to vector<1x1x128xf32>
    tpu.vector_store %arg17[%c0_120, %c0_121, %c0_122], %308 {strides = array<i32>} : memref<1x1x128xf32, #tpu.memory_space<vmem>>, vector<1x1x128xf32>,
    return
  }
  func.func @transform_0(%arg0: i32) -> (i32, i32, i32) {
    %c0_i32 = arith.constant 0 : i32
    %c0_i32_0 = arith.constant 0 : i32
    %c0_i32_1 = arith.constant 0 : i32
    return %arg0, %c0_i32, %c0_i32_0 : i32, i32, i32
  }
  func.func @transform_1(%arg0: i32) -> (i32, i32) {
    %c0_i32 = arith.constant 0 : i32
    %c0_i32_0 = arith.constant 0 : i32
    %c0_i32_1 = arith.constant 0 : i32
    return %c0_i32, %c0_i32_0 : i32, i32
  }
  func.func @transform_2(%arg0: i32) -> (i32, i32, i32) {
    %c0_i32 = arith.constant 0 : i32
    %c0_i32_0 = arith.constant 0 : i32
    %c0_i32_1 = arith.constant 0 : i32
    return %arg0, %c0_i32, %c0_i32_0 : i32, i32, i32
  }
  func.func @transform_3(%arg0: i32) -> (i32, i32) {
    %c0_i32 = arith.constant 0 : i32
    %c0_i32_0 = arith.constant 0 : i32
    %c0_i32_1 = arith.constant 0 : i32
    return %c0_i32, %c0_i32_0 : i32, i32
  }
  func.func @transform_4(%arg0: i32) -> (i32, i32) {
    %c0_i32 = arith.constant 0 : i32
    %c0_i32_0 = arith.constant 0 : i32
    %c0_i32_1 = arith.constant 0 : i32
    return %c0_i32, %c0_i32_0 : i32, i32
  }
  func.func @transform_5(%arg0: i32) -> (i32, i32, i32) {
    %c0_i32 = arith.constant 0 : i32
    %c0_i32_0 = arith.constant 0 : i32
    %c0_i32_1 = arith.constant 0 : i32
    %c0_i32_2 = arith.constant 0 : i32
    return %c0_i32, %c0_i32_0, %c0_i32_1 : i32, i32, i32
  }
  func.func @transform_6(%arg0: i32) -> (i32, i32, i32) {
    %c0_i32 = arith.constant 0 : i32
    %c0_i32_0 = arith.constant 0 : i32
    %c0_i32_1 = arith.constant 0 : i32
    %c0_i32_2 = arith.constant 0 : i32
    return %c0_i32, %c0_i32_0, %c0_i32_1 : i32, i32, i32
  }
  func.func @transform_7(%arg0: i32) -> (i32, i32, i32) {
    %c0_i32 = arith.constant 0 : i32
    %c0_i32_0 = arith.constant 0 : i32
    %c0_i32_1 = arith.constant 0 : i32
    %c0_i32_2 = arith.constant 0 : i32
    return %c0_i32, %c0_i32_0, %c0_i32_1 : i32, i32, i32
  }
  func.func @transform_8(%arg0: i32) -> (i32, i32, i32) {
    %c0_i32 = arith.constant 0 : i32
    %c0_i32_0 = arith.constant 0 : i32
    %c0_i32_1 = arith.constant 0 : i32
    %c0_i32_2 = arith.constant 0 : i32
    return %c0_i32, %c0_i32_0, %c0_i32_1 : i32, i32, i32
  }
  func.func @transform_9(%arg0: i32) -> (i32, i32, i32) {
    %c0_i32 = arith.constant 0 : i32
    %c0_i32_0 = arith.constant 0 : i32
    %c0_i32_1 = arith.constant 0 : i32
    %c0_i32_2 = arith.constant 0 : i32
    return %c0_i32, %c0_i32_0, %c0_i32_1 : i32, i32, i32
  }
  func.func @transform_10(%arg0: i32) -> (i32, i32, i32) {
    %c0_i32 = arith.constant 0 : i32
    %c0_i32_0 = arith.constant 0 : i32
    %c0_i32_1 = arith.constant 0 : i32
    %c0_i32_2 = arith.constant 0 : i32
    return %c0_i32, %c0_i32_0, %c0_i32_1 : i32, i32, i32
  }
  func.func @transform_11(%arg0: i32) -> (i32, i32, i32) {
    %c0_i32 = arith.constant 0 : i32
    %c0_i32_0 = arith.constant 0 : i32
    %c0_i32_1 = arith.constant 0 : i32
    %c0_i32_2 = arith.constant 0 : i32
    return %c0_i32, %c0_i32_0, %c0_i32_1 : i32, i32, i32
  }
  func.func @transform_12(%arg0: i32) -> (i32, i32) {
    %c0_i32 = arith.constant 0 : i32
    %c0_i32_0 = arith.constant 0 : i32
    %c0_i32_1 = arith.constant 0 : i32
    return %c0_i32, %c0_i32_0 : i32, i32
  }
  func.func @transform_13(%arg0: i32) -> (i32, i32) {
    %c0_i32 = arith.constant 0 : i32
    %c0_i32_0 = arith.constant 0 : i32
    %c0_i32_1 = arith.constant 0 : i32
    return %c0_i32, %c0_i32_0 : i32, i32
  }
  func.func @transform_14(%arg0: i32) -> (i32, i32) {
    %c0_i32 = arith.constant 0 : i32
    %c0_i32_0 = arith.constant 0 : i32
    %c0_i32_1 = arith.constant 0 : i32
    return %c0_i32, %c0_i32_0 : i32, i32
  }
  func.func @transform_15(%arg0: i32) -> (i32, i32) {
    %c0_i32 = arith.constant 0 : i32
    %c0_i32_0 = arith.constant 0 : i32
    %c0_i32_1 = arith.constant 0 : i32
    return %c0_i32, %c0_i32_0 : i32, i32
  }
  func.func @transform_16(%arg0: i32) -> (i32, i32, i32) {
    %c0_i32 = arith.constant 0 : i32
    %c0_i32_0 = arith.constant 0 : i32
    %c0_i32_1 = arith.constant 0 : i32
    return %arg0, %c0_i32, %c0_i32_0 : i32, i32, i32
  }
}

</mosaic_0001>

<bundles_post_ra>
// kernel: bert_classifier_forward.1
= control target key start
LH: loop header
LB: loop body
LE: loop exit
PB: predicated region body
PF: predicated region fallthrough
CT: control target
= control target key end

     0   :  { %s2977_s0 = inlined_call_operand.vmem [shape: f32[2,8,32], index: 0, kind: input, shape index: {}]   ;;  %s2978_s1 = inlined_call_operand.vmem [shape: f32[8,32], index: 1, kind: input, shape index: {}]   ;;  %s2979_s2 = inlined_call_operand.vmem [shape: f32[2,1,8], index: 2, kind: input, shape index: {}]   ;;  %s2980_s3 = inlined_call_operand.vmem [shape: f32[1,32], index: 3, kind: input, shape index: {}]   ;;  %s2981_s4 = inlined_call_operand.vmem [shape: f32[1,32], index: 4, kind: input, shape index: {}]   ;;  %s2982_s5 = inlined_call_operand.vmem [shape: bf16[2,32,96], index: 5, kind: input, shape index: {}]   ;;  %s2983_s6 = inlined_call_operand.vmem [shape: f32[2,1,96], index: 6, kind: input, shape index: {}]   ;;  %s2984_s7 = inlined_call_operand.vmem [shape: bf16[2,32,32], index: 7, kind: input, shape index: {}]   ;;  %s2985_s8 = inlined_call_operand.vmem [shape: bf16[2,32,64], index: 8, kind: input, shape index: {}]   ;;  %s2986_s9 = inlined_call_operand.vmem [shape: f32[2,1,64], index: 9, kind: input, shape index: {}]   ;;  %s2987_s10 = inlined_call_operand.vmem [shape: bf16[2,64,32], index: 10, kind: input, shape index: {}]   ;;  %s2988_s11 = inlined_call_operand.vmem [shape: f32[2,6,32], index: 11, kind: input, shape index: {}]   ;;  %s2989_s12 = inlined_call_operand.vmem [shape: f32[32,32], index: 12, kind: input, shape index: {}]   ;;  %s2990_s13 = inlined_call_operand.vmem [shape: f32[1,32], index: 13, kind: input, shape index: {}]   ;;  %s2991_s14 = inlined_call_operand.vmem [shape: f32[32,128], index: 14, kind: input, shape index: {}]   ;;  %s2992_s15 = inlined_call_operand.vmem [shape: f32[1,128], index: 15, kind: input, shape index: {}]   ;;  %s2993_s16 = inlined_call_operand.hbm [shape: f32[2,1,128], index: 16, kind: output, shape index: {}]  }
   0x1   :  { %3000 = sst [smem:[#allocation8_spill]] %s2977_s0 }
   0x2   :  { %3001 = sst [smem:[#allocation9_spill]] %s2978_s1 }
   0x3   :  { %3002 = sst [smem:[#allocation10_spill]] %s2979_s2 }
   0x4   :  { %21 = vsyncpa [#allocation3], 0 }
   0x5   :  { %23 = vsyncpa [#allocation3 + $0x1], 0  ;;  %s2567_s21 = smov 0   ;;  %s2569_s22 = smov 0  }
   0x6   :  { %s2571_s23 = smov 0   ;;  %s2573_s24 = smov 0  }
   0x7 LB: > { %3003 = sst [smem:[#allocation5_spill]] %s2467_s23  ;;  %s2588_s25 = sadd.s32 4294967295, %s2471_s24   ;;  %s2471_s24 = sphi %s2573_s24, %s3014_s24   ;;  %s2467_s23 = sphi %s2571_s23, %s3016_s23   ;;  %s2463_s22 = sphi %s2569_s22, %s3018_s22   ;;  %s2459_s21 = sphi %s2567_s21, %s3017_s21  }
   0x8   : > { %s2014_s26 = sadd.s32 4294967294, %s2471_s24   ;;  %s2592_s27 = sadd.s32 1, %s2471_s24  }
   0x9   : > { %3004 = sst [smem:[#allocation6_spill]] %s2592_s27  ;;  %s382_s28 = sadd.s32 1, %s2467_s23 }
   0xa   : > { %s379_s29 = ssub.s32 %s2471_s24, %s2592_s27  ;;  %p392_p0 = scmp.ne.s32.totalorder %s2467_s23, %s2463_s22 }
   0xb   : > { %p380_p1 = scmp.eq.s32.totalorder %s379_s29, 0  ;;  %p393_p2 = scmp.eq.s32.totalorder %s2588_s25, 1 }
   0xc   : > { %p398_p3 = scmp.ne.s32.totalorder %s2463_s22, %s2459_s21  ;;  %p399_p4 = scmp.eq.s32.totalorder %s2014_s26, 1 }
   0xd   : > { %s2603_s30 = scalar_select %p380_p1, %s2467_s23, %s382_s28  }
   0xe   : > { %p2605_p5 = por %p393_p2, %p392_p0  ;;  %p2609_p6 = por %p399_p4, %p398_p3 }
   0xf   : > { %3005 = sst [smem:[#allocation7_spill]] %s2603_s30  ;;  %p2017_p7 = scmp.ge.s32.totalorder %s2471_s24, 1 }
  0x10   : > { %p472_p8 = scmp.lt.s32.totalorder %s2471_s24, 3 }
  0x12   : > { %p473_p9 = pnand %p2017_p7, %p472_p8 }
  0x13   : > { %p523_p10 = scmp.lt.s32.totalorder (!%p473_p9), %s2588_s25, 1  ;;  %s3008_s1 = sld [smem:[#allocation9_spill]] (!%p473_p9)  ;;  %vm536_vm0 = vcmask (!%p473_p9), 261120   ;;  %v2357_v9 = vld [vmem:[%s2982_s5] sm:$0xff] (!%p473_p9)   ;;  %v2473_v10 = vmov (!%p473_p9), 0.0   ;;  %vm2474_vm1 = vmmov (!%p473_p9), 0  }
  0x14   : > { %476 = sbr.rel (%p473_p9) target bundleno = 5577 (0x15c9), region = 84  ;;  %s3009_s30 = sld [smem:[#allocation8_spill]] (!%p473_p9)  ;;  %2148 = vmatprep.subr.bf16.mxu0 (!%p473_p9), %v2473_v10  ;;  %2152 = vmatprep.mubr.msk.bf16.mxu0 (!%p473_p9), %vm2474_vm1, %v2473_v10  ;;  %v2358_v11 = vld [vmem:[%s2982_s5 + $0x8] sm:$0xff] (!%p473_p9)   ;;  %v2019_v16 = vld [vmem:[%s2980_s3] ss:$0 sm:$0xff] (!%p473_p9)  ;;  %vm648_vm2 = vcmask (!%p473_p9), 130048  }
  0x15   : > { %2149 = vmatpush3.bf16.msra.mxu0 (!%p473_p9), %v2357_v9  ;;  %2156 = vmatprep.subr.bf16.mxu1 (!%p473_p9), %v2473_v10  ;;  %v2020_v18 = vld [vmem:[%s2981_s4] ss:$0 sm:$0xff] (!%p473_p9)  ;;  %s2477_s27 = smov (!%p473_p9), 80   ;;  %s3010_s2 = sld [smem:[#allocation10_spill]] (!%p473_p9)  ;;  %vm695_vm3 = vcmask (!%p473_p9), 64512   ;;  %vm713_vm4 = vcmask (!%p473_p9), 1043456  }
  0x16   : > { %2150 = vmatprep.subr.bf16.mxu0 (!%p473_p9), %v2473_v10  ;;  %2158 = vmatprep.mubr.msk.bf16.mxu1 (!%p473_p9), %vm2474_vm1, %v2473_v10  ;;  %v2021_v22 = vld [vmem:[%s2983_s6] ss:$0 sm:$0xff] (!%p473_p9)  ;;  %s2998_s29 = smov (!%p473_p9), 64   ;;  %vm1106_vm5 = vcmask (!%p473_p9), 523264   ;;  %s3011_s20 = smov (!%p473_p9), 112  }
  0x19   : > { %v532_v0 = vld [vmem:[%s3008_s1] sm:$0xff] (!%p473_p9)  ;;  %2151 = vmatpush3.bf16.msra.mxu0 (!%p473_p9), %v2358_v11 }
  0x1a   : > { %2162 = vmatprep.subr.bf16.mxu0 (!%p473_p9), %v2473_v10 }
  0x1b   : > { %s2617_s18 = scalar_select %p523_p10, %s2588_s25, 1 }
  0x1d   : > { %s2018_s19 = sshll.u32 %s2617_s18, 3  ;;  %s529_s28 = scalar_lea.vmem %s3010_s2, %s2617_s18 }
  0x1e   : > { %s526_s23 = scalar_lea.vmem %s3009_s30, %s2018_s19  ;;  %s2476_s30 = smov 96   ;;  %v2674_v34 = vld [vmem:[%s529_s28] ss:$0 sm:$0xff] }
  0x1f   : > { %v531_v1 = vld [vmem:[%s526_s23] sm:$0xff]  ;;  %s2999_s23 = smov 112   ;;  %s2997_s18 = smov 48  }
  0x20   : > { %v533_v2 = vadd.f32 %v532_v0, %v531_v1  ;;  %s2089_s28 = sshll.u32 %s2588_s25, 4  ;;  %s2481_s25 = smov [#allocation2]  }
  0x21   : > { %s2413_s26 = sshll.u32 %s2481_s25, 4  ;;  %s2414_s26 = int_to_ptr.vmem [resolvable:$false] %s2413_s26 }
  0x22   : > { %v537_v3 = vsel %vm536_vm0, %v533_v2, 0.0  ;;  %s2415_s2 = scalar_lea.vmem %s2414_s26, 32 }
  0x23   : > { %538 = vadd.xlane.f32.xlu0 %v537_v3 }
  0xb0   : > { %v539_v4 = vpop.xlane.xlu0 %538 }
  0xb1   : > { %v541_v5 = vmul.f32 0.03125, %v539_v4 }
  0xb3   : > { %v542_v6 = vsub.f32 %v533_v2, %v541_v5  ;;  %v2359_v5 = vld [vmem:[%s2984_s7] sm:$0xff]  }
  0xb5   : > { %v543_v7 = vmul.f32 %v542_v6, %v542_v6 }
  0xb7   : > { %v544_v8 = vsel %vm536_vm0, %v543_v7, 0.0 }
  0xb8   : > { %545 = vadd.xlane.f32.xlu0 %v544_v8 }
 0x145   : > { %v546_v12 = vpop.xlane.xlu0 %545 }
 0x146   : > { %v547_v13 = vmul.f32 0.03125, %v546_v12 }
 0x148   : > { %v548_v14 = vadd.f32 1e-12, %v547_v13 }
 0x14a   : > { %2377 = vrsqrt.f32 %v548_v14 }
 0x154   : > { %v2378_v15 = vpop.eup %2377 }
 0x155   : > { %v550_v17 = vmul.f32 %v2378_v15, %v542_v6  ;;  %v2360_v6 = vld [vmem:[%s2984_s7 + $0x8] sm:$0xff]  }
 0x157   : > { %v557_v19 = vmul.f32 %v2019_v16, %v550_v17 }
 0x159   : > { %v564_v20 = vadd.f32 %v2020_v18, %v557_v19  ;;  %v967_v18 = vlaneseq }
 0x15b   : > { %v2648_v21 = vpack.c.bf16 %v564_v20, %v564_v20  ;;  %v2708_v19 = vshrl.u32 %v967_v18, 7 }
 0x15d   : > { %2153 = vmatmul.mubr.msk.bf16.vlgmr.msra.gmra.mrb[0].mxu0 %vm536_vm0, %v2648_v21 }
 0x15e   : > { %2164 = vmatprep.mubr.msk.bf16.mxu0 %vm2474_vm1, %v2473_v10 }
 0x230   : > { %v628_v23 = vpop.f32.mrb[0].mxu0 }
 0x231   : > { %v629_v24 = vadd.f32 %v2021_v22, %v628_v23  ;;  %v2154_v25 = vpop.f32.mrb[1].mxu0 }
 0x232   : > { %v631_v26 = vpop.f32.mrb[2].mxu0  ;;  %v969_v25 = vsub.s32 0, %v2708_v19 }
 0x233   : > { %v634_v27 = vpack.c.bf16 %v629_v24, %v629_v24  ;;  %v2155_v28 = vpop.f32.mrb[3].mxu0  ;;  %v2714_v26 = vld [vmem:[%s2988_s11] sm:$0x3f] }
 0x235   : > { %758 = vrot.lane.b32.xlu0 %v634_v27, %s2999_s23  ;;  %646 = vrot.lane.b32.xlu1 %v634_v27, %s2476_s30 }
 0x239   : > { %760 = vrot.lane.b32.xlu1 %v634_v27, %s2477_s27 }
 0x2a7   : > { %v647_v29 = vpop.permute.xlu1 %646  ;;  %v759_v33 = vpop.permute.xlu0 %758 }
 0x2a8   : > { %v653_v30 = vsel %vm648_vm2, %v647_v29, 0 }
 0x2a9   : > { %2157 = vmatpush3.bf16.xpose.msra.mxu1 %v653_v30 }
 0x2aa   : > { %2168 = vmatprep.subr.bf16.mxu1 %v2473_v10 }
 0x2ab   : > { %v761_v31 = vpop.permute.xlu1 %760 }
 0x2ac   : > { %v766_v32 = vsel %vm648_vm2, %v761_v31, 0 }
 0x2b0   : > { %2159 = vmatmul.mubr.msk.bf16.vlgmr.msra.gmra.mrb[0].mxu1 %vm648_vm2, %v634_v27 }
 0x2b1   : > { %2169 = vmatpush3.bf16.xpose.msra.mxu1 %v766_v32  ;;  %2170 = vmatprep.mubr.msk.bf16.mxu1 %vm2474_vm1, %v2473_v10 }
 0x2b2   : > { %2180 = vmatprep.subr.bf16.mxu1 %v2473_v10 }
 0x2b8   : > { %2171 = vmatmul.mubr.msk.bf16.vlgmr.msra.gmra.mrb[4].mxu1 %vm648_vm2, %v759_v33 }
 0x2b9   : > { %2182 = vmatprep.mubr.msk.bf16.mxu1 %vm2474_vm1, %v2473_v10  ;;  %2181 = vmatpush3.bf16.msra.mxu1 %v2360_v6 }
 0x2ba   : > { %2192 = vmatprep.subr.bf16.mxu1 %v2473_v10 }
 0x383   : > { %v689_v35 = vpop.f32.mrb[0].mxu1 }
 0x384   : > { %v690_v36 = vadd.f32 %v2674_v34, %v689_v35  ;;  %v2160_v37 = vpop.f32.mrb[1].mxu1  ;;  %v972_v35 = vunpack.c.l.bf16 %v2648_v21  ;;  %v2362_v21 = vld [vmem:[%s2985_s8 + $0x8] sm:$0xff]  }
 0x385   : > { %v692_v38 = vpop.f32.mrb[2].mxu1 }
 0x386   : > { %v2161_v39 = vpop.f32.mrb[3].mxu1  ;;  %v696_v40 = vsel %vm695_vm3, %v690_v36, -inf }
 0x387   : > { %697 = vmax.xlane.f32.xlu1 %v696_v40 }
 0x38b   : > { %v802_v41 = vpop.f32.mrb[4].mxu1 }
 0x38c   : > { %v803_v42 = vadd.f32 %v2674_v34, %v802_v41  ;;  %v2172_v43 = vpop.f32.mrb[5].mxu1 }
 0x38d   : > { %v805_v44 = vpop.f32.mrb[6].mxu1  ;;  %v2361_v43 = vld [vmem:[%s2985_s8] sm:$0xff]  }
 0x38e   : > { %v2173_v45 = vpop.f32.mrb[7].mxu1  ;;  %v808_v46 = vsel %vm695_vm3, %v803_v42, -inf }
 0x38f   : > { %809 = vmax.xlane.f32.xlu0 %v808_v46 }
 0x3a5   : > { %820 = vrot.lane.b32.xlu0 %v634_v27, %s2997_s18  ;;  %s2935_s18 = scalar_lea.hbm %s2993_s16, %s2089_s28 }
 0x414   : > { %v698_v47 = vpop.xlane.xlu1 %697 }
 0x415   : > { %v699_v48 = vsub.f32 %v690_v36, %v698_v47  ;;  %v989_v47 = vsub.s32 1, %v2708_v19 }
 0x417   : > { %v700_v49 = vmul.f32 1.442695, %v699_v48  ;;  %v994_v48 = vsub.s32 2, %v2708_v19 }
 0x419   : > { %2379 = vpow2.f32 %v700_v49  ;;  %v990_v49 = vrot.slane %v2714_v26, %v989_v47 }
 0x41c   : > { %v810_v50 = vpop.xlane.xlu0 %809 }
 0x41d   : > { %v811_v51 = vsub.f32 %v803_v42, %v810_v50 }
 0x41f   : > { %v812_v52 = vmul.f32 1.442695, %v811_v51 }
 0x420   : > { %v821_v63 = vpop.permute.xlu0 %820 }
 0x421   : > { %2381 = vpow2.f32 %v812_v52  ;;  %v826_v1 = vsel %vm713_vm4, %v821_v63, 0  ;;  %v995_v52 = vrot.slane %v2714_v26, %v994_v48 }
 0x423   : > { %v2380_v53 = vpop.eup %2379 }
 0x424   : > { %v702_v54 = vsel %vm695_vm3, %v2380_v53, 0.0 }
 0x425   : > { %703 = vadd.xlane.f32.xlu1 %v702_v54 }
 0x42b   : > { %v2382_v55 = vpop.eup %2381 }
 0x42c   : > { %v814_v56 = vsel %vm695_vm3, %v2382_v55, 0.0 }
 0x42d   : > { %815 = vadd.xlane.f32.xlu1 %v814_v56  ;;  %v2363_v56 = vld [vmem:[%s2987_s10] sm:$0xff]  }
 0x43e   : > { %708 = vrot.lane.b32.xlu1 %v634_v27, %s2998_s29  ;;  %v970_v27 = vrot.slane %v2714_v26, %v969_v25  ;;  %s521_s29 = sand.u32 1, %s2463_s22  }
 0x43f   : > { %s1938_s1 = scalar_lea.sflag [#allocation3], %s521_s29 }
 0x4b2   : > { %v704_v57 = vpop.xlane.xlu1 %703 }
 0x4b3   : > { %2383 = vrcp.f32 %v704_v57  ;;  %v2364_v57 = vld [vmem:[%s2987_s10 + $0x8] sm:$0xff]  }
 0x4ba   : > { %v816_v58 = vpop.xlane.xlu1 %815 }
 0x4bb   : > { %2385 = vrcp.f32 %v816_v58  ;;  %v2365_v58 = vld [vmem:[%s2987_s10 + $0x10] sm:$0xff]  }
 0x4bd   : > { %v2384_v59 = vpop.eup %2383 }
 0x4be   : > { %v706_v60 = vmul.f32 %v2384_v59, %v2380_v53  ;;  %v709_v61 = vpop.permute.xlu1 %708  ;;  %v2366_v59 = vld [vmem:[%s2987_s10 + $0x18] sm:$0xff]  }
 0x4bf   : > { %v715_v62 = vsel %vm713_vm4, %v709_v61, 0 }
 0x4c0   : > { %2163 = vmatpush3.bf16.msra.mxu0 %v715_v62  ;;  %v707_v0 = vpack.c.bf16 %v706_v60, %v706_v60  ;;  %v2034_v60 = vld [vmem:[%s2986_s9] ss:$0 sm:$0xff] }
 0x4c1   : > { %2174 = vmatprep.subr.bf16.mxu0 %v2473_v10 }
 0x4c3   : > { %2165 = vmatmul.mubr.msk.bf16.vlgmr.msra.gmra.mrb[4].mxu0 %vm695_vm3, %v707_v0 }
 0x4c4   : > { %2175 = vmatpush3.bf16.msra.mxu0 %v826_v1  ;;  %2176 = vmatprep.mubr.msk.bf16.mxu0 %vm2474_vm1, %v2473_v10 }
 0x4c5   : > { %v2386_v2 = vpop.eup %2385  ;;  %2186 = vmatprep.subr.bf16.mxu0 %v2473_v10 }
 0x4c6   : > { %v818_v3 = vmul.f32 %v2386_v2, %v2382_v55 }
 0x4c8   : > { %v819_v4 = vpack.c.bf16 %v818_v3, %v818_v3 }
 0x4cb   : > { %2177 = vmatmul.mubr.msk.bf16.vlgmr.msra.gmra.mrb[8].mxu0 %vm695_vm3, %v819_v4 }
 0x4cc   : > { %2188 = vmatprep.mubr.msk.bf16.mxu0 %vm2474_vm1, %v2473_v10  ;;  %2187 = vmatpush3.bf16.msra.mxu0 %v2359_v5 }
 0x4cd   : > { %2200 = vmatprep.subr.bf16.mxu0 %v2473_v10 }
 0x596   : > { %v751_v7 = vpop.f32.mrb[4].mxu0 }
 0x597   : > { %v757_v8 = vpack.c.bf16 %v751_v7, %v751_v7  ;;  %v2166_v9 = vpop.f32.mrb[5].mxu0 }
 0x598   : > { %v754_v11 = vpop.f32.mrb[6].mxu0 }
 0x599   : > { %v2167_v12 = vpop.f32.mrb[7].mxu0  ;;  %2189 = vmatmul.mubr.msk.bf16.vlgmr.msra.gmra.mrb[12].mxu0 %vm648_vm2, %v757_v8  ;;  %v1080_v8 = vsub.s32 3, %v2708_v19 }
 0x59a   : > { %2208 = vmatprep.mubr.msk.bf16.mxu0 %vm2474_vm1, %v2473_v10  ;;  %2201 = vmatpush3.bf16.msra.mxu0 %v2363_v56 }
 0x59b   : > { %2202 = vmatprep.subr.bf16.mxu0 %v2473_v10  ;;  %v1081_v9 = vrot.slane %v2714_v26, %v1080_v8 }
 0x59e   : > { %v862_v13 = vpop.f32.mrb[8].mxu0  ;;  %2203 = vmatpush3.bf16.msra.mxu0 %v2364_v57 }
 0x59f   : > { %v868_v14 = vpack.c.bf16 %v862_v13, %v862_v13  ;;  %v2178_v15 = vpop.f32.mrb[9].mxu0  ;;  %2204 = vmatprep.subr.bf16.mxu0 %v2473_v10 }
 0x5a0   : > { %v865_v16 = vpop.f32.mrb[10].mxu0 }
 0x5a1   : > { %v2179_v17 = vpop.f32.mrb[11].mxu0  ;;  %2183 = vmatmul.mubr.msk.bf16.vlgmr.msra.gmra.mrb[8].mxu1 %vm648_vm2, %v868_v14 }
 0x5a2   : > { %2196 = vmatprep.mubr.msk.bf16.mxu1 %vm2474_vm1, %v2473_v10  ;;  %2193 = vmatpush3.bf16.msra.mxu1 %v2361_v43 }
 0x5a3   : > { %2194 = vmatprep.subr.bf16.mxu1 %v2473_v10  ;;  %2205 = vmatpush3.bf16.msra.mxu0 %v2365_v58 }
 0x5a4   : > { %2206 = vmatprep.subr.bf16.mxu0 %v2473_v10 }
 0x5a6   : > { %2195 = vmatpush3.bf16.msra.mxu1 %v2362_v21 }
 0x5a7   : > { %2212 = vmatprep.subr.bf16.mxu1 %v2473_v10  ;;  %2207 = vmatpush3.bf16.msra.mxu0 %v2366_v59 }
 0x5a8   : > { %2226 = vmatprep.subr.bf16.mxu0 %v2473_v10 }
 0x66c   : > { %v961_v20 = vpop.f32.mrb[12].mxu0 }
 0x66d   : > { %v2190_v22 = vpop.f32.mrb[13].mxu0 }
 0x66e   : > { %v964_v23 = vpop.f32.mrb[14].mxu0 }
 0x66f   : > { %v2191_v24 = vpop.f32.mrb[15].mxu0 }
 0x674   : > { %v912_v28 = vpop.f32.mrb[8].mxu1 }
 0x675   : > { %v962_v29 = vadd.f32 %v961_v20, %v912_v28  ;;  %v2184_v30 = vpop.f32.mrb[9].mxu1  ;;  %v2368_v28 = vld [vmem:[%s2982_s5 + $0x18] sm:$0xff]  }
 0x676   : > { %v915_v31 = vpop.f32.mrb[10].mxu1 }
 0x677   : > { %v971_v32 = vadd.f32 %v970_v27, %v962_v29  ;;  %v2185_v33 = vpop.f32.mrb[11].mxu1  ;;  %v2367_v27 = vld [vmem:[%s2982_s5 + $0x10] sm:$0xff]  }
 0x678   : > { %v1171_v33 = vsub.s32 5, %v2708_v19 }
 0x679   : > { %v973_v36 = vadd.f32 %v972_v35, %v971_v32  ;;  %v1166_v32 = vsub.s32 4, %v2708_v19  ;;  %v1860_v19 = vld [vmem:[%s2991_s14 + $0x10] sm:$0xff] }
 0x67b   : > { %v974_v37 = vsel %vm536_vm0, %v973_v36, 0.0  ;;  %v1167_v35 = vrot.slane %v2714_v26, %v1166_v32 }
 0x67c   : > { %975 = vadd.xlane.f32.xlu1 %v974_v37 }
 0x709   : > { %v976_v38 = vpop.xlane.xlu1 %975 }
 0x70a   : > { %v977_v39 = vmul.f32 0.03125, %v976_v38  ;;  %v1172_v38 = vrot.slane %v2714_v26, %v1171_v33 }
 0x70c   : > { %v978_v40 = vsub.f32 %v973_v36, %v977_v39 }
 0x70e   : > { %v979_v41 = vmul.f32 %v978_v40, %v978_v40 }
 0x710   : > { %v980_v42 = vsel %vm536_vm0, %v979_v41, 0.0 }
 0x711   : > { %981 = vadd.xlane.f32.xlu0 %v980_v42  ;;  %v2049_v42 = vld [vmem:[%s2983_s6 + $0x1] ss:$0 sm:$0xff] }
 0x79e   : > { %v982_v44 = vpop.xlane.xlu0 %981 }
 0x79f   : > { %v983_v45 = vmul.f32 0.03125, %v982_v44 }
 0x7a1   : > { %v984_v46 = vadd.f32 1e-12, %v983_v45 }
 0x7a3   : > { %2387 = vrsqrt.f32 %v984_v46 }
 0x7ad   : > { %v2388_v50 = vpop.eup %2387 }
 0x7ae   : > { %v986_v51 = vmul.f32 %v2388_v50, %v978_v40 }
 0x7b0   : > { %v991_v53 = vmul.f32 %v990_v49, %v986_v51 }
 0x7b2   : > { %v996_v54 = vadd.f32 %v995_v52, %v991_v53 }
 0x7b4   : > { %v997_v55 = vpack.c.bf16 %v996_v54, %v996_v54 }
 0x7b6   : > { %2197 = vmatmul.mubr.msk.bf16.vlgmr.msra.gmra.mrb[12].mxu1 %vm536_vm0, %v997_v55 }
 0x7b7   : > { %2216 = vmatprep.mubr.msk.bf16.mxu1 %vm2474_vm1, %v2473_v10  ;;  %2213 = vmatpush3.bf16.msra.mxu1 %v2367_v27 }
 0x7b8   : > { %2214 = vmatprep.subr.bf16.mxu1 %v2473_v10 }
 0x7bb   : > { %2215 = vmatpush3.bf16.msra.mxu1 %v2368_v28 }
 0x7bc   : > { %2220 = vmatprep.subr.bf16.mxu1 %v2473_v10 }
 0x889   : > { %v1058_v61 = vpop.f32.mrb[12].mxu1 }
 0x88a   : > { %v1059_v62 = vadd.f32 %v2034_v60, %v1058_v61  ;;  %v2198_v63 = vpop.f32.mrb[13].mxu1 }
 0x88b   : > { %v1061_v0 = vpop.f32.mrb[14].mxu1 }
 0x88c   : > { %v1065_v1 = vmul.f32 0.70710677, %v1059_v62  ;;  %v2199_v2 = vpop.f32.mrb[15].mxu1  ;;  %v1064_v4 = vmul.f32 0.5, %v1059_v62 }
 0x88e   : > { %2389 = verf.f32 %v1065_v1 }
 0x898   : > { %v2390_v3 = vpop.eup %2389 }
 0x899   : > { %v1067_v5 = vadd.f32 1.0, %v2390_v3 }
 0x89b   : > { %v1068_v6 = vmul.f32 %v1067_v5, %v1064_v4 }
 0x89d   : > { %v1069_v7 = vpack.c.bf16 %v1068_v6, %v1068_v6 }
 0x89f   : > { %2209 = vmatmul.mubr.msk.bf16.vlgmr.msra.gmra.mrb[16].mxu0 %vm1106_vm5, %v1069_v7 }
 0x8a0   : > { %2228 = vmatprep.mubr.msk.bf16.mxu0 %vm2474_vm1, %v2473_v10 }
 0x972   : > { %v1144_v11 = vpop.f32.mrb[16].mxu0 }
 0x973   : > { %v1145_v12 = vadd.f32 %v1144_v11, %v1081_v9  ;;  %v2210_v13 = vpop.f32.mrb[17].mxu0 }
 0x974   : > { %v1147_v14 = vpop.f32.mrb[18].mxu0 }
 0x975   : > { %v2211_v15 = vpop.f32.mrb[19].mxu0  ;;  %v1150_v16 = vadd.f32 %v1145_v12, %v996_v54 }
 0x977   : > { %v1151_v17 = vsel %vm536_vm0, %v1150_v16, 0.0 }
 0x978   : > { %1152 = vadd.xlane.f32.xlu1 %v1151_v17 }
 0xa05   : > { %v1153_v18 = vpop.xlane.xlu1 %1152 }
 0xa06   : > { %v1154_v20 = vmul.f32 0.03125, %v1153_v18 }
 0xa08   : > { %v1155_v22 = vsub.f32 %v1150_v16, %v1154_v20 }
 0xa0a   : > { %v1156_v23 = vmul.f32 %v1155_v22, %v1155_v22 }
 0xa0c   : > { %v1157_v24 = vsel %vm536_vm0, %v1156_v23, 0.0 }
 0xa0d   : > { %1158 = vadd.xlane.f32.xlu1 %v1157_v24 }
 0xa9a   : > { %v1159_v29 = vpop.xlane.xlu1 %1158 }
 0xa9b   : > { %v1160_v30 = vmul.f32 0.03125, %v1159_v29  ;;  %v2369_v29 = vld [vmem:[%s2984_s7 + $0x10] sm:$0xff]  }
 0xa9d   : > { %v1161_v31 = vadd.f32 1e-12, %v1160_v30  ;;  %v2370_v30 = vld [vmem:[%s2984_s7 + $0x18] sm:$0xff]  }
 0xa9f   : > { %2391 = vrsqrt.f32 %v1161_v31 }
 0xaa9   : > { %v2392_v36 = vpop.eup %2391 }
 0xaaa   : > { %v1163_v37 = vmul.f32 %v2392_v36, %v1155_v22 }
 0xaac   : > { %v1168_v39 = vmul.f32 %v1167_v35, %v1163_v37 }
 0xaae   : > { %v1173_v40 = vadd.f32 %v1172_v38, %v1168_v39 }
 0xab0   : > { %v2785_v41 = vpack.c.bf16 %v1173_v40, %v1173_v40 }
 0xab2   : > { %2217 = vmatmul.mubr.msk.bf16.vlgmr.msra.gmra.mrb[16].mxu1 %vm536_vm0, %v2785_v41 }
 0xab3   : > { %2222 = vmatprep.mubr.msk.bf16.mxu1 %vm2474_vm1, %v2473_v10 }
 0xb85   : > { %v1239_v43 = vpop.f32.mrb[16].mxu1 }
 0xb86   : > { %v1240_v21 = vadd.f32 %v2049_v42, %v1239_v43  ;;  %v2218_v44 = vpop.f32.mrb[17].mxu1 }
 0xb87   : > { %v1242_v45 = vpop.f32.mrb[18].mxu1 }
 0xb88   : > { %v1245_v46 = vpack.c.bf16 %v1240_v21, %v1240_v21  ;;  %v2219_v26 = vpop.f32.mrb[19].mxu1 }
 0xb8a   : > { %1363 = vrot.lane.b32.xlu0 %v1245_v46, %s2477_s27  ;;  %1252 = vrot.lane.b32.xlu1 %v1245_v46, %s2476_s30  ;;  %s3012_s30 = smov 64   ;;  %s3013_s27 = smov 48  }
 0xb8e   : > { %1361 = vrot.lane.b32.xlu1 %v1245_v46, %s3011_s20  ;;  %s522_s20 = scalar_lea.vmem [#allocation2], %s521_s29 }
 0xbfc   : > { %v1253_v49 = vpop.permute.xlu1 %1252  ;;  %v1364_v51 = vpop.permute.xlu0 %1363 }
 0xbfd   : > { %v1258_v50 = vsel %vm648_vm2, %v1253_v49, 0  ;;  %v1369_v52 = vsel %vm648_vm2, %v1364_v51, 0  ;;  %v2842_v49 = vld [vmem:[%s2988_s11 + $0x8] sm:$0x3f] }
 0xbfe   : > { %2221 = vmatpush3.bf16.xpose.msra.mxu1 %v1258_v50  ;;  %v1573_v50 = vrot.slane %v2842_v49, %v969_v25  ;;  %v2371_v25 = vld [vmem:[%s2985_s8 + $0x10] sm:$0xff]  }
 0xbff   : > { %2232 = vmatprep.subr.bf16.mxu1 %v2473_v10 }
 0xc00   : > { %v1362_v53 = vpop.permute.xlu1 %1361 }
 0xc05   : > { %2223 = vmatmul.mubr.msk.bf16.vlgmr.msra.gmra.mrb[20].mxu1 %vm648_vm2, %v1245_v46 }
 0xc06   : > { %2233 = vmatpush3.bf16.xpose.msra.mxu1 %v1369_v52  ;;  %2234 = vmatprep.mubr.msk.bf16.mxu1 %vm2474_vm1, %v2473_v10 }
 0xc07   : > { %2244 = vmatprep.subr.bf16.mxu1 %v2473_v10 }
 0xc0d   : > { %2235 = vmatmul.mubr.msk.bf16.vlgmr.msra.gmra.mrb[24].mxu1 %vm648_vm2, %v1362_v53 }
 0xc0e   : > { %2246 = vmatprep.mubr.msk.bf16.mxu1 %vm2474_vm1, %v2473_v10  ;;  %2245 = vmatpush3.bf16.msra.mxu1 %v2370_v30  ;;  %v1687_v30 = vrot.slane %v2842_v49, %v1080_v8  ;;  %v1779_v8 = vld [vmem:[%s2989_s12] sm:$0xff] }
 0xc0f   : > { %2256 = vmatprep.subr.bf16.mxu1 %v2473_v10 }
 0xcd8   : > { %v1294_v54 = vpop.f32.mrb[20].mxu1 }
 0xcd9   : > { %v1295_v55 = vadd.f32 %v2674_v34, %v1294_v54  ;;  %v2224_v56 = vpop.f32.mrb[21].mxu1 }
 0xcda   : > { %v1297_v57 = vpop.f32.mrb[22].mxu1 }
 0xcdb   : > { %v2225_v58 = vpop.f32.mrb[23].mxu1  ;;  %v1300_v59 = vsel %vm695_vm3, %v1295_v55, -inf  ;;  %v1575_v57 = vunpack.c.l.bf16 %v2785_v41  ;;  %v2372_v41 = vld [vmem:[%s2985_s8 + $0x18] sm:$0xff]  }
 0xcdc   : > { %1301 = vmax.xlane.f32.xlu1 %v1300_v59 }
 0xce0   : > { %v1405_v60 = vpop.f32.mrb[24].mxu1 }
 0xce1   : > { %v1406_v61 = vadd.f32 %v2674_v34, %v1405_v60  ;;  %v2236_v62 = vpop.f32.mrb[25].mxu1 }
 0xce2   : > { %v1408_v63 = vpop.f32.mrb[26].mxu1 }
 0xce3   : > { %v2237_v0 = vpop.f32.mrb[27].mxu1  ;;  %v1411_v1 = vsel %vm695_vm3, %v1406_v61, -inf }
 0xce4   : > { %1412 = vmax.xlane.f32.xlu0 %v1411_v1 }
 0xd69   : > { %v1302_v2 = vpop.xlane.xlu1 %1301 }
 0xd6a   : > { %v1303_v3 = vsub.f32 %v1295_v55, %v1302_v2 }
 0xd6c   : > { %v1304_v4 = vmul.f32 1.442695, %v1303_v3 }
 0xd6e   : > { %2393 = vpow2.f32 %v1304_v4  ;;  %v1593_v4 = vrot.slane %v2842_v49, %v989_v47  ;;  %v2374_v47 = vld [vmem:[%s2987_s10 + $0x28] sm:$0xff]  }
 0xd71   : > { %v1413_v5 = vpop.xlane.xlu0 %1412 }
 0xd72   : > { %v1414_v6 = vsub.f32 %v1406_v61, %v1413_v5 }
 0xd74   : > { %v1415_v7 = vmul.f32 1.442695, %v1414_v6 }
 0xd76   : > { %2395 = vpow2.f32 %v1415_v7  ;;  %v1598_v7 = vrot.slane %v2842_v49, %v994_v48  ;;  %v2375_v48 = vld [vmem:[%s2987_s10 + $0x30] sm:$0xff]  }
 0xd78   : > { %v2394_v9 = vpop.eup %2393 }
 0xd79   : > { %v1306_v11 = vsel %vm695_vm3, %v2394_v9, 0.0 }
 0xd7a   : > { %1307 = vadd.xlane.f32.xlu0 %v1306_v11 }
 0xd80   : > { %v2396_v12 = vpop.eup %2395 }
 0xd81   : > { %v1417_v34 = vsel %vm695_vm3, %v2396_v12, 0.0 }
 0xd82   : > { %1418 = vadd.xlane.f32.xlu1 %v1417_v34  ;;  %v2373_v34 = vld [vmem:[%s2987_s10 + $0x20] sm:$0xff]  }
 0xd90   : > { %1312 = vrot.lane.b32.xlu0 %v1245_v46, %s3012_s30  ;;  %s1950_s30 = sshll.u32 %s522_s20, 4  ;;  %s2937_s30 = int_to_ptr.vmem [resolvable:$true] %s1950_s30 }
 0xd91   : > { %s2409_s19 = scalar_lea.vmem %s2937_s30, 16  ;;  %p2416_p0 = scmp.lt.s32.totalorder %s2937_s30, %s2414_s26 }
 0xd92   : > { %p2410_p11 = scmp.ne.s32.totalorder %s2937_s30, %s2409_s19  ;;  %p2417_p1 = scmp.lt.s32.totalorder %s2415_s2, %s2409_s19 }
 0xd93   : > { %1423 = vrot.lane.b32.xlu1 %v1245_v46, %s3013_s27 }
 0xd94   : > { %p2411_p12 = pnand %p2410_p11, %p2605_p5  ;;  %p2418_p2 = por %p2417_p1, %p2416_p0 }
 0xd96   : > { %p2412_p13 = pneg %p2411_p12 }
 0xd98   : > { %p2419_p3 = pnand %p2418_p2, %p2412_p13 }
 0xe07   : > { %v1308_v13 = vpop.xlane.xlu0 %1307 }
 0xe08   : > { %2397 = vrcp.f32 %v1308_v13  ;;  %v2376_v13 = vld [vmem:[%s2987_s10 + $0x38] sm:$0xff]  }
 0xe0b   : > { %v1313_v14 = vpop.permute.xlu0 %1312 }
 0xe0c   : > { %v1318_v15 = vsel %vm713_vm4, %v1313_v14, 0  ;;  %v2070_v14 = vld [vmem:[%s2986_s9 + $0x1] ss:$0 sm:$0xff] }
 0xe0d   : > { %2227 = vmatpush3.bf16.msra.mxu0 %v1318_v15 }
 0xe0e   : > { %2238 = vmatprep.subr.bf16.mxu0 %v2473_v10 }
 0xe0f   : > { %v1419_v16 = vpop.xlane.xlu1 %1418 }
 0xe10   : > { %2399 = vrcp.f32 %v1419_v16 }
 0xe12   : > { %v2398_v17 = vpop.eup %2397 }
 0xe13   : > { %v1310_v18 = vmul.f32 %v2398_v17, %v2394_v9  ;;  %v1424_v20 = vpop.permute.xlu1 %1423 }
 0xe14   : > { %v1429_v23 = vsel %vm713_vm4, %v1424_v20, 0 }
 0xe15   : > { %v1311_v22 = vpack.c.bf16 %v1310_v18, %v1310_v18 }
 0xe17   : > { %2229 = vmatmul.mubr.msk.bf16.vlgmr.msra.gmra.mrb[20].mxu0 %vm695_vm3, %v1311_v22 }
 0xe18   : > { %2239 = vmatpush3.bf16.msra.mxu0 %v1429_v23  ;;  %2240 = vmatprep.mubr.msk.bf16.mxu0 %vm2474_vm1, %v2473_v10 }
 0xe19   : > { %2250 = vmatprep.subr.bf16.mxu0 %v2473_v10 }
 0xe1a   : > { %v2400_v24 = vpop.eup %2399 }
 0xe1b   : > { %v1421_v27 = vmul.f32 %v2400_v24, %v2396_v12 }
 0xe1d   : > { %v1422_v28 = vpack.c.bf16 %v1421_v27, %v1421_v27 }
 0xe1f   : > { %2241 = vmatmul.mubr.msk.bf16.vlgmr.msra.gmra.mrb[24].mxu0 %vm695_vm3, %v1422_v28 }
 0xe20   : > { %2252 = vmatprep.mubr.msk.bf16.mxu0 %vm2474_vm1, %v2473_v10  ;;  %2251 = vmatpush3.bf16.msra.mxu0 %v2369_v29 }
 0xe21   : > { %2264 = vmatprep.subr.bf16.mxu0 %v2473_v10 }
 0xeea   : > { %v1354_v31 = vpop.f32.mrb[20].mxu0 }
 0xeeb   : > { %v1360_v35 = vpack.c.bf16 %v1354_v31, %v1354_v31  ;;  %v2230_v36 = vpop.f32.mrb[21].mxu0 }
 0xeec   : > { %v1357_v37 = vpop.f32.mrb[22].mxu0 }
 0xeed   : > { %v2231_v38 = vpop.f32.mrb[23].mxu0  ;;  %2253 = vmatmul.mubr.msk.bf16.vlgmr.msra.gmra.mrb[28].mxu0 %vm648_vm2, %v1360_v35 }
 0xeee   : > { %2272 = vmatprep.mubr.msk.bf16.mxu0 %vm2474_vm1, %v2473_v10  ;;  %2265 = vmatpush3.bf16.msra.mxu0 %v2373_v34 }
 0xeef   : > { %2266 = vmatprep.subr.bf16.mxu0 %v2473_v10 }
 0xef2   : > { %v1465_v39 = vpop.f32.mrb[24].mxu0  ;;  %2267 = vmatpush3.bf16.msra.mxu0 %v2374_v47 }
 0xef3   : > { %v1471_v40 = vpack.c.bf16 %v1465_v39, %v1465_v39  ;;  %v2242_v42 = vpop.f32.mrb[25].mxu0  ;;  %2268 = vmatprep.subr.bf16.mxu0 %v2473_v10 }
 0xef4   : > { %v1468_v43 = vpop.f32.mrb[26].mxu0 }
 0xef5   : > { %v2243_v21 = vpop.f32.mrb[27].mxu0  ;;  %2247 = vmatmul.mubr.msk.bf16.vlgmr.msra.gmra.mrb[28].mxu1 %vm648_vm2, %v1471_v40 }
 0xef6   : > { %2260 = vmatprep.mubr.msk.bf16.mxu1 %vm2474_vm1, %v2473_v10  ;;  %2257 = vmatpush3.bf16.msra.mxu1 %v2371_v25 }
 0xef7   : > { %2258 = vmatprep.subr.bf16.mxu1 %v2473_v10  ;;  %2269 = vmatpush3.bf16.msra.mxu0 %v2375_v48 }
 0xef8   : > { %2270 = vmatprep.subr.bf16.mxu0 %v2473_v10 }
 0xefa   : > { %2259 = vmatpush3.bf16.msra.mxu1 %v2372_v41 }
 0xefb   : > { %2271 = vmatpush3.bf16.msra.mxu0 %v2376_v13 }
 0xfc0   : > { %v1564_v44 = vpop.f32.mrb[28].mxu0 }
 0xfc1   : > { %v2254_v45 = vpop.f32.mrb[29].mxu0 }
 0xfc2   : > { %v1567_v46 = vpop.f32.mrb[30].mxu0 }
 0xfc3   : > { %v2255_v26 = vpop.f32.mrb[31].mxu0  ;;  %v1780_v46 = vld [vmem:[%s2989_s12 + $0x8] sm:$0xff] }
 0xfc4   : > { %v2299_v26 = vpack.c.bf16 %v1780_v46, %v1779_v8 }
 0xfc8   : > { %v1515_v51 = vpop.f32.mrb[28].mxu1 }
 0xfc9   : > { %v1565_v52 = vadd.f32 %v1564_v44, %v1515_v51  ;;  %v2248_v53 = vpop.f32.mrb[29].mxu1  ;;  %v1781_v51 = vld [vmem:[%s2989_s12 + $0x10] sm:$0xff] }
 0xfca   : > { %v1518_v54 = vpop.f32.mrb[30].mxu1 }
 0xfcb   : > { %v1574_v55 = vadd.f32 %v1573_v50, %v1565_v52  ;;  %v2249_v56 = vpop.f32.mrb[31].mxu1  ;;  %v2480_v50 = vmov 0.0|0.0   ;;  %v1782_v52 = vld [vmem:[%s2989_s12 + $0x18] sm:$0xff] }
 0xfcc   : > { %2298 = vmatprep.subr.bf16.mxu1 %v2480_v50  ;;  %v2302_v53 = vpack.c.bf16 %v1782_v52, %v1781_v51 }
 0xfcd   : > { %v1576_v58 = vadd.f32 %v1575_v57, %v1574_v55  ;;  %v1772_v57 = vrot.slane %v2842_v49, %v1166_v32  ;;  %v1859_v32 = vld [vmem:[%s2991_s14 + $0x8] sm:$0xff] }
 0xfcf   : > { %v1577_v59 = vsel %vm536_vm0, %v1576_v58, 0.0 }
 0xfd0   : > { %1578 = vadd.xlane.f32.xlu1 %v1577_v59 }
0x105d   : > { %v1579_v60 = vpop.xlane.xlu1 %1578 }
0x105e   : > { %v1580_v61 = vmul.f32 0.03125, %v1579_v60  ;;  %v1777_v60 = vrot.slane %v2842_v49, %v1171_v33  ;;  %v1861_v49 = vld [vmem:[%s2991_s14 + $0x18] sm:$0xff] }
0x1060   : > { %v1581_v62 = vsub.f32 %v1576_v58, %v1580_v61 }
0x1062   : > { %v1582_v63 = vmul.f32 %v1581_v62, %v1581_v62 }
0x1064   : > { %v1583_v0 = vsel %vm536_vm0, %v1582_v63, 0.0  ;;  %v1858_v63 = vld [vmem:[%s2991_s14] sm:$0xff] }
0x1065   : > { %1584 = vadd.xlane.f32.xlu0 %v1583_v0  ;;  %v2305_v33 = vpack.c.bf16 %v1859_v32, %v1858_v63  ;;  %v1783_v0 = vld [vmem:[%s2990_s13] sm:$0x1] }
0x10f2   : > { %v1585_v1 = vpop.xlane.xlu0 %1584 }
0x10f3   : > { %v1586_v2 = vmul.f32 0.03125, %v1585_v1 }
0x10f5   : > { %v1587_v3 = vadd.f32 1e-12, %v1586_v2 }
0x10f7   : > { %2401 = vrsqrt.f32 %v1587_v3  ;;  %v1862_v3 = vld [vmem:[%s2992_s15] sm:$0x1] }
0x1101   : > { %v2402_v5 = vpop.eup %2401 }
0x1102   : > { %v1589_v6 = vmul.f32 %v2402_v5, %v1581_v62 }
0x1104   : > { %v1594_v9 = vmul.f32 %v1593_v4, %v1589_v6 }
0x1106   : > { %v1599_v11 = vadd.f32 %v1598_v7, %v1594_v9 }
0x1108   : > { %v1600_v12 = vpack.c.bf16 %v1599_v11, %v1599_v11 }
0x110a   : > { %2261 = vmatmul.mubr.msk.bf16.vlgmr.msra.gmra.mrb[32].mxu1 %vm536_vm0, %v1600_v12 }
0x110b   : > { %2284 = vmatprep.mubr.msk.f32.mxu1 %vm2474_vm1, %v2473_v10  ;;  %2300 = vmatpush3.bf16.msra.mxu1 %v2299_v26 }
0x110c   : > { %2301 = vmatprep.subr.bf16.mxu1 %v2480_v50 }
0x110f   : > { %2303 = vmatpush3.bf16.msra.mxu1 %v2302_v53 }
0x1110   : > { %2304 = vmatprep.subr.bf16.mxu1 %v2480_v50 }
0x11dd   : > { %v1663_v15 = vpop.f32.mrb[32].mxu1 }
0x11de   : > { %v1664_v16 = vadd.f32 %v2070_v14, %v1663_v15  ;;  %v2262_v17 = vpop.f32.mrb[33].mxu1 }
0x11df   : > { %v1666_v18 = vpop.f32.mrb[34].mxu1 }
0x11e0   : > { %v1670_v20 = vmul.f32 0.70710677, %v1664_v16  ;;  %v2263_v22 = vpop.f32.mrb[35].mxu1  ;;  %v1669_v24 = vmul.f32 0.5, %v1664_v16 }
0x11e2   : > { %2403 = verf.f32 %v1670_v20 }
0x11ec   : > { %v2404_v23 = vpop.eup %2403 }
0x11ed   : > { %v1672_v27 = vadd.f32 1.0, %v2404_v23 }
0x11ef   : > { %v1673_v28 = vmul.f32 %v1672_v27, %v1669_v24 }
0x11f1   : > { %v1674_v29 = vpack.c.bf16 %v1673_v28, %v1673_v28 }
0x11f3   : > { %2273 = vmatmul.mubr.msk.bf16.vlgmr.msra.gmra.mrb[32].mxu0 %vm1106_vm5, %v1674_v29 }
0x12c6   : > { %v1749_v31 = vpop.f32.mrb[32].mxu0 }
0x12c7   : > { %v1750_v35 = vadd.f32 %v1749_v31, %v1687_v30  ;;  %v2274_v36 = vpop.f32.mrb[33].mxu0 }
0x12c8   : > { %v1752_v37 = vpop.f32.mrb[34].mxu0 }
0x12c9   : > { %v2275_v38 = vpop.f32.mrb[35].mxu0  ;;  %v1755_v39 = vadd.f32 %v1750_v35, %v1599_v11 }
0x12cb   : > { %v1756_v40 = vsel %vm536_vm0, %v1755_v39, 0.0 }
0x12cc   : > { %1757 = vadd.xlane.f32.xlu0 %v1756_v40 }
0x1359   : > { %v1758_v42 = vpop.xlane.xlu0 %1757 }
0x135a   : > { %v1759_v43 = vmul.f32 0.03125, %v1758_v42 }
0x135c   : > { %v1760_v21 = vsub.f32 %v1755_v39, %v1759_v43 }
0x135e   : > { %v1761_v44 = vmul.f32 %v1760_v21, %v1760_v21 }
0x1360   : > { %v1762_v45 = vsel %vm536_vm0, %v1761_v44, 0.0 }
0x1361   : > { %1763 = vadd.xlane.f32.xlu1 %v1762_v45 }
0x13ee   : > { %v1764_v54 = vpop.xlane.xlu1 %1763 }
0x13ef   : > { %v1765_v55 = vmul.f32 0.03125, %v1764_v54 }
0x13f1   : > { %v1766_v56 = vadd.f32 1e-12, %v1765_v55 }
0x13f3   : > { %2405 = vrsqrt.f32 %v1766_v56 }
0x13fd   : > { %v2406_v58 = vpop.eup %2405 }
0x13fe   : > { %v1768_v59 = vmul.f32 %v2406_v58, %v1760_v21 }
0x1400   : > { %v1773_v61 = vmul.f32 %v1772_v57, %v1768_v59 }
0x1402   : > { %v1778_v62 = vadd.f32 %v1777_v60, %v1773_v61 }
0x1404   : > { %2285 = vmatmul.mubr.msk.f32.vlgmr.msra.gmra.mrb[36].mxu1 %vm536_vm0, %v1778_v62 }
0x1405   : > { %2295 = vmatprep.mubr.msk.f32.mxu1 %vm2474_vm1, %v2473_v10  ;;  %2306 = vmatpush3.bf16.msra.mxu1 %v2305_v33  ;;  %v2308_v10 = vpack.c.bf16 %v1861_v49, %v1860_v19 }
0x1406   : > { %2307 = vmatprep.subr.bf16.mxu1 %v2480_v50 }
0x1409   : > { %2309 = vmatpush3.bf16.msra.mxu1 %v2308_v10 }
0x14d7   : > { %v1853_v25 = vpop.f32.mrb[36].mxu1 }
0x14d8   : > { %v1854_v41 = vadd.f32 %v1853_v25, %v1783_v0  ;;  %v2286_v1 = vpop.f32.mrb[37].mxu1 }
0x14da   : > { %2407 = vtanh.f32 %v1854_v41 }
0x14e4   : > { %v2408_v2 = vpop.eup %2407 }
0x14e5   : > { %2296 = vmatmul.mubr.msk.f32.vlgmr.msra.gmra.mrb[38].mxu1 %vm536_vm0, %v2408_v2 }
0x15b8   : > { %v1932_v4 = vpop.f32.mrb[38].mxu1 }
0x15b9   : > { %v1933_v5 = vadd.f32 %v1932_v4, %v1862_v3  ;;  %v2297_v6 = vpop.f32.mrb[39].mxu1 }
0x15bb   : > { %1936 = vst [vmem:[%s522_s20] sm:$0x1] %v1933_v5 }
0x15bc   : > { %2422 = shalt.err (!%p2419_p3)
}
0x15bd   : > { %s2423_s29 = scalar_lea.hbm %s2935_s18, 16  ;;  %s2427_s27 = scalar_lea.hbm %s2993_s16, 32 }
0x15be   : > { %p2424_p4 = scmp.ne.s32.totalorder %s2935_s18, %s2423_s29  ;;  %p2428_p9 = scmp.lt.u32.totalorder %s2935_s18, %s2993_s16 }
0x15bf   : > { %p2429_p10 = scmp.lt.u32.totalorder %s2427_s27, %s2423_s29  ;;  %p2431_p12 = scmp.lt.u32.totalorder %s2423_s29, %s2935_s18 }
0x15c0   : > { %p2425_p7 = pnand %p2424_p4, %p2605_p5 }
0x15c1   : > { %p2430_p11 = por %p2429_p10, %p2428_p9 }
0x15c2   : > { %p2426_p8 = pneg %p2425_p7 }
0x15c3   : > { %p2432_p13 = por %p2431_p12, %p2430_p11 }
0x15c5   : > { %p2433_p0 = pnand %p2432_p13, %p2426_p8 }
0x15c7   : > { %2436 = shalt.err (!%p2433_p0)
}
0x15c8   : > { %2310 = dma.vmem_to_hbm [thread:$0]  (%p2605_p5), %s2937_s30, 16, %s2935_s18, %s1938_s1  }
0x15c9 PF: > { %p2316_p1 = scmp.ge.s32.totalorder %s2471_s24, 2  ;;  %s1962_s2 = sand.u32 1, %s2459_s21  }
0x15ca   : > { %s1963_s19 = scalar_lea.sflag [#allocation3], %s1962_s2 }
0x15cb   : > { %p2313_p2 = pnand %p2316_p1, %p2609_p6 }
0x15cd   : > { %2454 = dma.done.wait (!%p2313_p2), %s1963_s19, 16  }
0x15ce   : > { %2456 = vsyncadd (!%p2313_p2), %s1963_s19, 4294967280  ;;  %s3014_s24 = sld [smem:[#allocation6_spill]]  ;;  %s3015_s26 = sld [smem:[#allocation5_spill]] }
0x15cf   : > { %s3016_s23 = sld [smem:[#allocation7_spill]]  ;;  %s3017_s21 = smov %s2463_s22 }
0x15d4   : > { %p26_p3 = scmp.ge.s32.totalorder %s3014_s24, 4   ;;  %s3018_s22 = smov %s3015_s26 }
0x15d6   :  { %28 = sbr.rel (!%p26_p3) target bundleno = 7 (0x7), region = 129 }
0x15dd   :  { %1967 = vsyncpa [#allocation3], 1 }
0x15de   :  { %1969 = vsyncpa [#allocation3 + $0x1], 1 }

</bundles_post_ra>
